<compile_context>
chip_gen: v7x
topology: tpu7x:2x2x1
jax: 0.10.0
libtpu: 0.0.40
codegen_flags: <defaults>
</compile_context>

<pallas_src>
import jax
import jax.numpy as jnp
from jax.experimental import pallas as pl
from jax.experimental.pallas import tpu as pltpu

# ---------------- configuration (small, consistent with the module) ----------------
NUM_USERS = 6
NUM_ITEMS = 8
EMBEDDING_DIM = 128
ID_EMBEDDING_SIZE = 16          # id embeddings for non-multimodal node types; unused in forward
NUM_HEADS = 4
GAT_IN = 32                     # per-modality transform output size
GAT_OUT = 32                    # per-head GAT output size
N_NODES = 8                     # graph nodes (movies)
BATCH = 2
NEG_SLOPE = 0.2                 # DGL GATConv default negative_slope

FEATURE_SIZES = {
    "movieimage": 64,
    "movietext": 48,
    "movieaudio": 40,
    "genre": 12,                # extra node type -> gets an (unused) id embedding
}
MODALITIES = ("image", "text", "audio")
MOD_FEATS = ("movieimage", "movietext", "movieaudio")

N_MOD = 3
H_TOT = N_MOD * GAT_IN                                  # 96  (block-diag transform out)
Z_TOT = N_MOD * NUM_HEADS * GAT_OUT                     # 384 (all GAT head outputs)
MH = N_MOD * NUM_HEADS                                  # 12  (modality x head pairs)
F_TOT = sum(FEATURE_SIZES[k] for k in MOD_FEATS)        # 152 (real feature lanes)
ONES_COL = F_TOT                                        # constant-1 column folds Linear biases
K_PAD = 256                                             # lane-dense padded feature width


# ---------------------------------- fused kernel ------------------------------------
def _fused_gat_fc_kernel(feat_ref,   # (N, K_PAD)  bf16  [img | txt | aud | 1 | 0-pad]
                         w1_ref,     # (K_PAD, 96) bf16  block-diag transforms (+ bias row)
                         wg_ref,     # (96, 384)   bf16  block-diag GAT fc
                         alt_ref,    # (12, 384)   bf16  attn_l: row (m,h) holds a_l[m,h] at its z-slice
                         art_ref,    # (12, 384)   bf16  attn_r
                         adj_ref,    # (N, N)      f32   adj[dst, src] in {0,1}
                         fcw_ref,    # (384, 128)  bf16  final fc weight
                         fcb_ref,    # (1, 128)    f32   final fc bias (+ folded GAT biases)
                         out_ref):   # (N, 128)    f32
    # Adjacency mask work: computed once, reused by all 12 (modality, head) pairs.
    mask = adj_ref[...] > 0.0                                  # (N, N)
    neg_bias = jnp.where(mask, 0.0, -1e30)

    # 1) All three modality transforms + ReLU in one block-diag matmul (bias via ones col).
    h = jnp.dot(feat_ref[...], w1_ref[...], preferred_element_type=jnp.float32)    # (N, 96) f32
    h = jnp.maximum(h, 0.0).astype(jnp.bfloat16)

    # 2) All three GAT projections in one block-diag matmul.
    #    Lane layout of z: [mod0: h0..h3 | mod1: h0..h3 | mod2: h0..h3], 32 lanes each.
    z = jnp.dot(h, wg_ref[...], preferred_element_type=jnp.float32)                # (N, 384) f32
    z_bf = z.astype(jnp.bfloat16)

    # 3) Attention scalars for all 12 (modality, head) pairs, produced directly in the
    #    transposed orientation needed below: el_T[mh, src], er_T[mh, dst].
    el_T = jax.lax.dot_general(alt_ref[...], z_bf, (((1,), (1,)), ((), ())),
                               preferred_element_type=jnp.float32)                 # (12, N)
    er_T = jax.lax.dot_general(art_ref[...], z_bf, (((1,), (1,)), ((), ())),
                               preferred_element_type=jnp.float32)                 # (12, N)

    # 4) Batched logits + masked softmax over the src axis for all 12 pairs at once (f32).
    e3 = er_T[:, :, None] + el_T[:, None, :]                                       # (12, Ndst, Nsrc)
    e3 = jnp.where(e3 >= 0.0, e3, NEG_SLOPE * e3)                                  # LeakyReLU
    e3 = e3 + neg_bias[None, :, :]                                                 # mask non-edges
    m3 = jnp.max(e3, axis=-1, keepdims=True)
    p3 = jnp.where(mask[None, :, :], jnp.exp(e3 - m3), 0.0)                        # re-mask (zero in-degree safe)
    denom = jnp.maximum(jnp.sum(p3, axis=-1, keepdims=True), 1e-30)
    alpha3 = (p3 * pl.reciprocal(denom, approx=True)).astype(jnp.bfloat16)         # (12, N, N)

    # 5) Per-head weighted sum folded straight into the final fc accumulator:
    #    no head concat, no (N, 384) concat is ever materialized.
    acc = jnp.zeros(out_ref.shape, jnp.float32)
    for mh in range(MH):
        lo = mh * GAT_OUT
        head = jnp.dot(alpha3[mh], z_bf[:, lo:lo + GAT_OUT],
                       preferred_element_type=jnp.float32)                         # (N, 32)
        acc = acc + jnp.dot(head.astype(jnp.bfloat16), fcw_ref[lo:lo + GAT_OUT, :],
                            preferred_element_type=jnp.float32)                    # (N, 128)

    # Single, unmasked full-lane store.
    out_ref[...] = jnp.maximum(acc + fcb_ref[...], 0.0)


# --------------------------------- kernel wrapper ------------------------------------
def fused_hetero_gat(feat, adj, packed):
    n = feat.shape[0]
    cost = pl.CostEstimate(flops=2_100_000, transcendentals=1_000, bytes_accessed=250_000)
    return pl.pallas_call(
        _fused_gat_fc_kernel,
        out_shape=jax.ShapeDtypeStruct((n, EMBEDDING_DIM), jnp.float32),
        in_specs=[pl.BlockSpec(memory_space=pltpu.MemorySpace.VMEM)] * 8,
        out_specs=pl.BlockSpec(memory_space=pltpu.MemorySpace.VMEM),
        cost_estimate=cost,
    )(feat, packed["w1"], packed["wg"], packed["alt"], packed["art"],
      adj, packed["fcw"], packed["fcb"])


# ------------------------------ parameter init --------------------------------------
def init_params(key):
    ks = jax.random.split(key, 16)
    p = {}
    p["user_embeddings"] = 0.1 * jax.random.normal(ks[0], (NUM_USERS, EMBEDDING_DIM), jnp.float32)
    p["item_embeddings"] = 0.1 * jax.random.normal(ks[1], (NUM_ITEMS, EMBEDDING_DIM), jnp.float32)
    # id embeddings for non-multimodal node types (constructed in __init__, unused in forward)
    p["id_embeddings"] = {
        "genre": 0.1 * jax.random.normal(ks[2], (10000, ID_EMBEDDING_SIZE), jnp.float32)
    }
    # per-modality Linear(feature_size -> 32), weights stored (in, out)
    p["image_w"] = 0.1 * jax.random.normal(ks[3], (FEATURE_SIZES["movieimage"], GAT_IN), jnp.float32)
    p["image_b"] = jnp.zeros((1, GAT_IN), jnp.float32)
    p["text_w"] = 0.1 * jax.random.normal(ks[4], (FEATURE_SIZES["movietext"], GAT_IN), jnp.float32)
    p["text_b"] = jnp.zeros((1, GAT_IN), jnp.float32)
    p["audio_w"] = 0.1 * jax.random.normal(ks[5], (FEATURE_SIZES["movieaudio"], GAT_IN), jnp.float32)
    p["audio_b"] = jnp.zeros((1, GAT_IN), jnp.float32)
    # GATConv(32, 32, num_heads=4) per modality: fc (32 -> H*32, no bias, head-major),
    # attn_l / attn_r (H, 32), output bias (1, H*32)
    for i, mod in enumerate(MODALITIES):
        kk = jax.random.split(ks[6 + i], 4)
        p[f"gat_{mod}_w"] = 0.1 * jax.random.normal(kk[0], (GAT_IN, NUM_HEADS * GAT_OUT), jnp.float32)
        p[f"gat_{mod}_al"] = 0.1 * jax.random.normal(kk[1], (NUM_HEADS, GAT_OUT), jnp.float32)
        p[f"gat_{mod}_ar"] = 0.1 * jax.random.normal(kk[2], (NUM_HEADS, GAT_OUT), jnp.float32)
        p[f"gat_{mod}_b"] = jnp.zeros((1, NUM_HEADS * GAT_OUT), jnp.float32)
    # fc: Linear(32*3*num_heads -> 128), rows ordered [image heads | text heads | audio heads]
    p["fc_w"] = 0.05 * jax.random.normal(ks[9], (GAT_OUT * 3 * NUM_HEADS, EMBEDDING_DIM), jnp.float32)
    p["fc_b"] = jnp.zeros((1, EMBEDDING_DIM), jnp.float32)
    return p


# --------------------- one-time weight packing (cache the result) --------------------
def pack_params(params):
    """Pack all weights into the fused-kernel layout. Run ONCE (or whenever weights
    change) and reuse across forward calls; only features / adj / ids vary per call."""
    f32 = jnp.float32
    sizes = [FEATURE_SIZES[k] for k in MOD_FEATS]
    offs = [0, sizes[0], sizes[0] + sizes[1]]

    # Block-diagonal modality transforms, Linear biases folded in via the ones column.
    w1 = jnp.zeros((K_PAD, H_TOT), f32)
    for m, mod in enumerate(MODALITIES):
        w, b = params[f"{mod}_w"], params[f"{mod}_b"]
        w1 = w1.at[offs[m]:offs[m] + sizes[m], m * GAT_IN:(m + 1) * GAT_IN].set(w)
        w1 = w1.at[ONES_COL, m * GAT_IN:(m + 1) * GAT_IN].set(b[0])

    # Block-diagonal GAT projection.
    wg = jnp.zeros((H_TOT, Z_TOT), f32)
    for m, mod in enumerate(MODALITIES):
        wg = wg.at[m * GAT_IN:(m + 1) * GAT_IN,
                   m * NUM_HEADS * GAT_OUT:(m + 1) * NUM_HEADS * GAT_OUT].set(params[f"gat_{mod}_w"])

    # Attention vectors scattered to their z-slice: row mh = m*H + h.
    alt = jnp.zeros((MH, Z_TOT), f32)
    art = jnp.zeros((MH, Z_TOT), f32)
    for m, mod in enumerate(MODALITIES):
        for h in range(NUM_HEADS):
            mh = m * NUM_HEADS + h
            c0 = m * NUM_HEADS * GAT_OUT + h * GAT_OUT
            alt = alt.at[mh, c0:c0 + GAT_OUT].set(params[f"gat_{mod}_al"][h])
            art = art.at[mh, c0:c0 + GAT_OUT].set(params[f"gat_{mod}_ar"][h])

    # Fold the GAT output biases through the final fc (exact, since fc is linear).
    fcw = params["fc_w"]
    fcb = params["fc_b"]
    for m, mod in enumerate(MODALITIES):
        blk = fcw[m * NUM_HEADS * GAT_OUT:(m + 1) * NUM_HEADS * GAT_OUT, :]
        fcb = fcb + params[f"gat_{mod}_b"] @ blk

    bf16 = jnp.bfloat16
    return {"w1": w1.astype(bf16), "wg": wg.astype(bf16),
            "alt": alt.astype(bf16), "art": art.astype(bf16),
            "fcw": fcw.astype(bf16), "fcb": fcb.astype(f32)}


# -------------------------------- forward pass ---------------------------------------
def hetero_graph_conv_forward(params, packed, user_ids, item_ids, adj=None, features=None):
    # embedding lookups: plain-JAX gathers (glue; not the matmul/softmax hot path)
    user_emb = jnp.take(params["user_embeddings"], user_ids, axis=0)
    item_emb = jnp.take(params["item_embeddings"], item_ids, axis=0)
    if adj is None or features is None:
        return user_emb, item_emb

    # Per-call prologue is just this concat + cast (weights are pre-packed in `packed`).
    n = adj.shape[0]
    feat = jnp.concatenate(
        [features["movieimage"], features["movietext"], features["movieaudio"],
         jnp.ones((n, 1), jnp.float32),
         jnp.zeros((n, K_PAD - ONES_COL - 1), jnp.float32)],
        axis=1).astype(jnp.bfloat16)                                           # (N, 256)

    combined = fused_hetero_gat(feat, adj.astype(jnp.float32), packed)         # (N, 128)
    return user_emb, item_emb, combined


# ------------------------------------ main -------------------------------------------
if __name__ == "__main__":
    key = jax.random.PRNGKey(0)
    kp, k1, k2, k3, k4, k5, k6 = jax.random.split(key, 7)

    params = init_params(kp)
    packed = pack_params(params)        # ONE-TIME packing; reused by every forward call

    user_ids = jax.random.randint(k1, (BATCH,), 0, NUM_USERS, dtype=jnp.int32)
    item_ids = jax.random.randint(k2, (BATCH,), 0, NUM_ITEMS, dtype=jnp.int32)

    features = {
        "movieimage": jax.random.normal(k3, (N_NODES, FEATURE_SIZES["movieimage"]), jnp.float32),
        "movietext": jax.random.normal(k4, (N_NODES, FEATURE_SIZES["movietext"]), jnp.float32),
        "movieaudio": jax.random.normal(k5, (N_NODES, FEATURE_SIZES["movieaudio"]), jnp.float32),
    }
    # dense adjacency adj[dst, src]; self-loops so every node has >= 1 in-edge
    adj = (jax.random.uniform(k6, (N_NODES, N_NODES)) < 0.4).astype(jnp.float32)
    adj = jnp.maximum(adj, jnp.eye(N_NODES, dtype=jnp.float32))

    forward = jax.jit(hetero_graph_conv_forward)
    user_emb, item_emb, combined = forward(params, packed, user_ids, item_ids, adj, features)
    jax.block_until_ready((user_emb, item_emb, combined))

    assert user_emb.shape == (BATCH, EMBEDDING_DIM)
    assert item_emb.shape == (BATCH, EMBEDDING_DIM)
    assert combined.shape == (N_NODES, EMBEDDING_DIM)
    assert bool(jnp.all(jnp.isfinite(combined)))
    print("KERNEL_OK")
</pallas_src>

<mosaic_0001>
module attributes {stable_mosaic.version = 11 : i64} {
  func.func @_fused_gat_fc_kernel(%arg0: memref<8x256xbf16, #tpu.memory_space<vmem>>, %arg1: memref<256x96xbf16, #tpu.memory_space<vmem>>, %arg2: memref<96x384xbf16, #tpu.memory_space<vmem>>, %arg3: memref<12x384xbf16, #tpu.memory_space<vmem>>, %arg4: memref<12x384xbf16, #tpu.memory_space<vmem>>, %arg5: memref<8x8xf32, #tpu.memory_space<vmem>>, %arg6: memref<384x128xbf16, #tpu.memory_space<vmem>>, %arg7: memref<1x128xf32, #tpu.memory_space<vmem>>, %arg8: memref<8x128xf32, #tpu.memory_space<vmem>>) attributes {dimension_semantics = [], scalar_prefetch = 0 : i64, scratch_operands = 0 : i64, tpu.core_type = #tpu.core_type<tc>} {
    %c0 = arith.constant 0 : index
    %c0_0 = arith.constant 0 : index
    %0 = vector.load %arg5[%c0, %c0_0] : memref<8x8xf32, #tpu.memory_space<vmem>>, vector<8x8xf32>
    %cst = arith.constant 0.000000e+00 : f32
    %1 = vector.broadcast %cst : f32 to vector<8x8xf32>
    %2 = arith.cmpf ogt, %0, %1 : vector<8x8xf32>
    %cst_1 = arith.constant 0.000000e+00 : f32
    %cst_2 = arith.constant -1.000000e+30 : f32
    %3 = vector.broadcast %cst_1 : f32 to vector<8x8xf32>
    %4 = vector.broadcast %cst_2 : f32 to vector<8x8xf32>
    %5 = arith.select %2, %3, %4 : vector<8x8xi1>, vector<8x8xf32>
    %c0_3 = arith.constant 0 : index
    %c0_4 = arith.constant 0 : index
    %6 = vector.load %arg0[%c0_3, %c0_4] : memref<8x256xbf16, #tpu.memory_space<vmem>>, vector<8x256xbf16>
    %c0_5 = arith.constant 0 : index
    %c0_6 = arith.constant 0 : index
    %7 = vector.load %arg1[%c0_5, %c0_6] : memref<256x96xbf16, #tpu.memory_space<vmem>>, vector<256x96xbf16>
    %cst_7 = arith.constant dense<0.000000e+00> : vector<8x96xf32>
    %8 = tpu.matmul %6, %7, %cst_7 {dimension_numbers = #tpu.dot_dimension_numbers<[1], [0], [0], [1], [0, 0, 1, 1], [], []>} : vector<8x256xbf16>, vector<256x96xbf16>, vector<8x96xf32> -> vector<8x96xf32>
    %cst_8 = arith.constant 0.000000e+00 : f32
    %9 = vector.broadcast %cst_8 : f32 to vector<8x96xf32>
    %10 = arith.maximumf %8, %9 : vector<8x96xf32>
    %11 = arith.truncf %10 : vector<8x96xf32> to vector<8x96xbf16>
    %c0_9 = arith.constant 0 : index
    %c0_10 = arith.constant 0 : index
    %12 = vector.load %arg2[%c0_9, %c0_10] : memref<96x384xbf16, #tpu.memory_space<vmem>>, vector<96x384xbf16>
    %cst_11 = arith.constant dense<0.000000e+00> : vector<8x384xf32>
    %13 = tpu.matmul %11, %12, %cst_11 {dimension_numbers = #tpu.dot_dimension_numbers<[1], [0], [0], [1], [0, 0, 1, 1], [], []>} : vector<8x96xbf16>, vector<96x384xbf16>, vector<8x384xf32> -> vector<8x384xf32>
    %14 = arith.truncf %13 : vector<8x384xf32> to vector<8x384xbf16>
    %c0_12 = arith.constant 0 : index
    %c0_13 = arith.constant 0 : index
    %15 = vector.load %arg3[%c0_12, %c0_13] : memref<12x384xbf16, #tpu.memory_space<vmem>>, vector<12x384xbf16>
    %cst_14 = arith.constant dense<0.000000e+00> : vector<12x8xf32>
    %16 = tpu.matmul %15, %14, %cst_14 {dimension_numbers = #tpu.dot_dimension_numbers<[1], [1], [0], [0], [0, 0, 1, 0], [], []>} : vector<12x384xbf16>, vector<8x384xbf16>, vector<12x8xf32> -> vector<12x8xf32>
    %c0_15 = arith.constant 0 : index
    %c0_16 = arith.constant 0 : index
    %17 = vector.load %arg4[%c0_15, %c0_16] : memref<12x384xbf16, #tpu.memory_space<vmem>>, vector<12x384xbf16>
    %cst_17 = arith.constant dense<0.000000e+00> : vector<12x8xf32>
    %18 = tpu.matmul %17, %14, %cst_17 {dimension_numbers = #tpu.dot_dimension_numbers<[1], [1], [0], [0], [0, 0, 1, 0], [], []>} : vector<12x384xbf16>, vector<8x384xbf16>, vector<12x8xf32> -> vector<12x8xf32>
    %19 = vector.shape_cast %18 : vector<12x8xf32> to vector<12x8x1xf32>
    %20 = vector.shape_cast %16 : vector<12x8xf32> to vector<12x1x8xf32>
    %21 = vector.broadcast %19 : vector<12x8x1xf32> to vector<12x8x8xf32>
    %22 = vector.broadcast %20 : vector<12x1x8xf32> to vector<12x8x8xf32>
    %23 = arith.addf %21, %22 : vector<12x8x8xf32>
    %cst_18 = arith.constant 0.000000e+00 : f32
    %24 = vector.broadcast %cst_18 : f32 to vector<12x8x8xf32>
    %25 = arith.cmpf oge, %23, %24 : vector<12x8x8xf32>
    %cst_19 = arith.constant 2.000000e-01 : f32
    %26 = vector.broadcast %cst_19 : f32 to vector<12x8x8xf32>
    %27 = arith.mulf %26, %23 : vector<12x8x8xf32>
    %28 = arith.select %25, %23, %27 : vector<12x8x8xi1>, vector<12x8x8xf32>
    %29 = vector.shape_cast %5 : vector<8x8xf32> to vector<1x8x8xf32>
    %30 = vector.broadcast %29 : vector<1x8x8xf32> to vector<12x8x8xf32>
    %31 = arith.addf %28, %30 : vector<12x8x8xf32>
    %cst_20 = arith.constant dense<0xFF800000> : vector<12x8xf32>
    %32 = vector.multi_reduction <maximumf>, %31, %cst_20 [2] : vector<12x8x8xf32> to vector<12x8xf32>
    %33 = vector.shape_cast %32 : vector<12x8xf32> to vector<12x8x1xf32>
    %34 = vector.shape_cast %2 : vector<8x8xi1> to vector<1x8x8xi1>
    %35 = vector.broadcast %33 : vector<12x8x1xf32> to vector<12x8x8xf32>
    %36 = arith.subf %31, %35 : vector<12x8x8xf32>
    %37 = math.exp %36 : vector<12x8x8xf32>
    %cst_21 = arith.constant 0.000000e+00 : f32
    %38 = vector.shape_cast %34 : vector<1x8x8xi1> to vector<1x8x8xi1>
    %39 = vector.broadcast %38 : vector<1x8x8xi1> to vector<12x8x8xi1>
    %40 = vector.broadcast %cst_21 : f32 to vector<12x8x8xf32>
    %41 = arith.select %39, %37, %40 : vector<12x8x8xi1>, vector<12x8x8xf32>
    %cst_22 = arith.constant dense<0.000000e+00> : vector<12x8xf32>
    %42 = vector.multi_reduction <add>, %41, %cst_22 [2] : vector<12x8x8xf32> to vector<12x8xf32>
    %43 = vector.shape_cast %42 : vector<12x8xf32> to vector<12x8x1xf32>
    %cst_23 = arith.constant 1.000000e-30 : f32
    %44 = vector.broadcast %cst_23 : f32 to vector<12x8x1xf32>
    %45 = arith.maximumf %43, %44 : vector<12x8x1xf32>
    %46 = tpu.reciprocal %45 {approx = true} : vector<12x8x1xf32> -> vector<12x8x1xf32>
    %47 = vector.broadcast %46 : vector<12x8x1xf32> to vector<12x8x8xf32>
    %48 = arith.mulf %41, %47 : vector<12x8x8xf32>
    %49 = arith.truncf %48 : vector<12x8x8xf32> to vector<12x8x8xbf16>
    %cst_24 = arith.constant 0.000000e+00 : f32
    %50 = vector.broadcast %cst_24 : f32 to vector<8x128xf32>
    %51 = vector.extract_strided_slice %49 {offsets = [0, 0, 0], sizes = [1, 8, 8], strides = [1, 1, 1]} : vector<12x8x8xbf16> to vector<1x8x8xbf16>
    %52 = vector.shape_cast %51 : vector<1x8x8xbf16> to vector<8x8xbf16>
    %53 = vector.extract_strided_slice %14 {offsets = [0, 0], sizes = [8, 32], strides = [1, 1]} : vector<8x384xbf16> to vector<8x32xbf16>
    %cst_25 = arith.constant dense<0.000000e+00> : vector<8x32xf32>
    %54 = tpu.matmul %52, %53, %cst_25 {dimension_numbers = #tpu.dot_dimension_numbers<[1], [0], [0], [1], [0, 0, 1, 1], [], []>} : vector<8x8xbf16>, vector<8x32xbf16>, vector<8x32xf32> -> vector<8x32xf32>
    %55 = arith.truncf %54 : vector<8x32xf32> to vector<8x32xbf16>
    %c0_26 = arith.constant 0 : index
    %c0_27 = arith.constant 0 : index
    %56 = vector.load %arg6[%c0_26, %c0_27] : memref<384x128xbf16, #tpu.memory_space<vmem>>, vector<32x128xbf16>
    %cst_28 = arith.constant dense<0.000000e+00> : vector<8x128xf32>
    %57 = tpu.matmul %55, %56, %cst_28 {dimension_numbers = #tpu.dot_dimension_numbers<[1], [0], [0], [1], [0, 0, 1, 1], [], []>} : vector<8x32xbf16>, vector<32x128xbf16>, vector<8x128xf32> -> vector<8x128xf32>
    %58 = arith.addf %50, %57 : vector<8x128xf32>
    %59 = vector.extract_strided_slice %49 {offsets = [1, 0, 0], sizes = [1, 8, 8], strides = [1, 1, 1]} : vector<12x8x8xbf16> to vector<1x8x8xbf16>
    %60 = vector.shape_cast %59 : vector<1x8x8xbf16> to vector<8x8xbf16>
    %61 = vector.extract_strided_slice %14 {offsets = [0, 32], sizes = [8, 32], strides = [1, 1]} : vector<8x384xbf16> to vector<8x32xbf16>
    %cst_29 = arith.constant dense<0.000000e+00> : vector<8x32xf32>
    %62 = tpu.matmul %60, %61, %cst_29 {dimension_numbers = #tpu.dot_dimension_numbers<[1], [0], [0], [1], [0, 0, 1, 1], [], []>} : vector<8x8xbf16>, vector<8x32xbf16>, vector<8x32xf32> -> vector<8x32xf32>
    %63 = arith.truncf %62 : vector<8x32xf32> to vector<8x32xbf16>
    %c32 = arith.constant 32 : index
    %c0_30 = arith.constant 0 : index
    %64 = vector.load %arg6[%c32, %c0_30] : memref<384x128xbf16, #tpu.memory_space<vmem>>, vector<32x128xbf16>
    %cst_31 = arith.constant dense<0.000000e+00> : vector<8x128xf32>
    %65 = tpu.matmul %63, %64, %cst_31 {dimension_numbers = #tpu.dot_dimension_numbers<[1], [0], [0], [1], [0, 0, 1, 1], [], []>} : vector<8x32xbf16>, vector<32x128xbf16>, vector<8x128xf32> -> vector<8x128xf32>
    %66 = arith.addf %58, %65 : vector<8x128xf32>
    %67 = vector.extract_strided_slice %49 {offsets = [2, 0, 0], sizes = [1, 8, 8], strides = [1, 1, 1]} : vector<12x8x8xbf16> to vector<1x8x8xbf16>
    %68 = vector.shape_cast %67 : vector<1x8x8xbf16> to vector<8x8xbf16>
    %69 = vector.extract_strided_slice %14 {offsets = [0, 64], sizes = [8, 32], strides = [1, 1]} : vector<8x384xbf16> to vector<8x32xbf16>
    %cst_32 = arith.constant dense<0.000000e+00> : vector<8x32xf32>
    %70 = tpu.matmul %68, %69, %cst_32 {dimension_numbers = #tpu.dot_dimension_numbers<[1], [0], [0], [1], [0, 0, 1, 1], [], []>} : vector<8x8xbf16>, vector<8x32xbf16>, vector<8x32xf32> -> vector<8x32xf32>
    %71 = arith.truncf %70 : vector<8x32xf32> to vector<8x32xbf16>
    %c64 = arith.constant 64 : index
    %c0_33 = arith.constant 0 : index
    %72 = vector.load %arg6[%c64, %c0_33] : memref<384x128xbf16, #tpu.memory_space<vmem>>, vector<32x128xbf16>
    %cst_34 = arith.constant dense<0.000000e+00> : vector<8x128xf32>
    %73 = tpu.matmul %71, %72, %cst_34 {dimension_numbers = #tpu.dot_dimension_numbers<[1], [0], [0], [1], [0, 0, 1, 1], [], []>} : vector<8x32xbf16>, vector<32x128xbf16>, vector<8x128xf32> -> vector<8x128xf32>
    %74 = arith.addf %66, %73 : vector<8x128xf32>
    %75 = vector.extract_strided_slice %49 {offsets = [3, 0, 0], sizes = [1, 8, 8], strides = [1, 1, 1]} : vector<12x8x8xbf16> to vector<1x8x8xbf16>
    %76 = vector.shape_cast %75 : vector<1x8x8xbf16> to vector<8x8xbf16>
    %77 = vector.extract_strided_slice %14 {offsets = [0, 96], sizes = [8, 32], strides = [1, 1]} : vector<8x384xbf16> to vector<8x32xbf16>
    %cst_35 = arith.constant dense<0.000000e+00> : vector<8x32xf32>
    %78 = tpu.matmul %76, %77, %cst_35 {dimension_numbers = #tpu.dot_dimension_numbers<[1], [0], [0], [1], [0, 0, 1, 1], [], []>} : vector<8x8xbf16>, vector<8x32xbf16>, vector<8x32xf32> -> vector<8x32xf32>
    %79 = arith.truncf %78 : vector<8x32xf32> to vector<8x32xbf16>
    %c96 = arith.constant 96 : index
    %c0_36 = arith.constant 0 : index
    %80 = vector.load %arg6[%c96, %c0_36] : memref<384x128xbf16, #tpu.memory_space<vmem>>, vector<32x128xbf16>
    %cst_37 = arith.constant dense<0.000000e+00> : vector<8x128xf32>
    %81 = tpu.matmul %79, %80, %cst_37 {dimension_numbers = #tpu.dot_dimension_numbers<[1], [0], [0], [1], [0, 0, 1, 1], [], []>} : vector<8x32xbf16>, vector<32x128xbf16>, vector<8x128xf32> -> vector<8x128xf32>
    %82 = arith.addf %74, %81 : vector<8x128xf32>
    %83 = vector.extract_strided_slice %49 {offsets = [4, 0, 0], sizes = [1, 8, 8], strides = [1, 1, 1]} : vector<12x8x8xbf16> to vector<1x8x8xbf16>
    %84 = vector.shape_cast %83 : vector<1x8x8xbf16> to vector<8x8xbf16>
    %85 = vector.extract_strided_slice %14 {offsets = [0, 128], sizes = [8, 32], strides = [1, 1]} : vector<8x384xbf16> to vector<8x32xbf16>
    %cst_38 = arith.constant dense<0.000000e+00> : vector<8x32xf32>
    %86 = tpu.matmul %84, %85, %cst_38 {dimension_numbers = #tpu.dot_dimension_numbers<[1], [0], [0], [1], [0, 0, 1, 1], [], []>} : vector<8x8xbf16>, vector<8x32xbf16>, vector<8x32xf32> -> vector<8x32xf32>
    %87 = arith.truncf %86 : vector<8x32xf32> to vector<8x32xbf16>
    %c128 = arith.constant 128 : index
    %c0_39 = arith.constant 0 : index
    %88 = vector.load %arg6[%c128, %c0_39] : memref<384x128xbf16, #tpu.memory_space<vmem>>, vector<32x128xbf16>
    %cst_40 = arith.constant dense<0.000000e+00> : vector<8x128xf32>
    %89 = tpu.matmul %87, %88, %cst_40 {dimension_numbers = #tpu.dot_dimension_numbers<[1], [0], [0], [1], [0, 0, 1, 1], [], []>} : vector<8x32xbf16>, vector<32x128xbf16>, vector<8x128xf32> -> vector<8x128xf32>
    %90 = arith.addf %82, %89 : vector<8x128xf32>
    %91 = vector.extract_strided_slice %49 {offsets = [5, 0, 0], sizes = [1, 8, 8], strides = [1, 1, 1]} : vector<12x8x8xbf16> to vector<1x8x8xbf16>
    %92 = vector.shape_cast %91 : vector<1x8x8xbf16> to vector<8x8xbf16>
    %93 = vector.extract_strided_slice %14 {offsets = [0, 160], sizes = [8, 32], strides = [1, 1]} : vector<8x384xbf16> to vector<8x32xbf16>
    %cst_41 = arith.constant dense<0.000000e+00> : vector<8x32xf32>
    %94 = tpu.matmul %92, %93, %cst_41 {dimension_numbers = #tpu.dot_dimension_numbers<[1], [0], [0], [1], [0, 0, 1, 1], [], []>} : vector<8x8xbf16>, vector<8x32xbf16>, vector<8x32xf32> -> vector<8x32xf32>
    %95 = arith.truncf %94 : vector<8x32xf32> to vector<8x32xbf16>
    %c160 = arith.constant 160 : index
    %c0_42 = arith.constant 0 : index
    %96 = vector.load %arg6[%c160, %c0_42] : memref<384x128xbf16, #tpu.memory_space<vmem>>, vector<32x128xbf16>
    %cst_43 = arith.constant dense<0.000000e+00> : vector<8x128xf32>
    %97 = tpu.matmul %95, %96, %cst_43 {dimension_numbers = #tpu.dot_dimension_numbers<[1], [0], [0], [1], [0, 0, 1, 1], [], []>} : vector<8x32xbf16>, vector<32x128xbf16>, vector<8x128xf32> -> vector<8x128xf32>
    %98 = arith.addf %90, %97 : vector<8x128xf32>
    %99 = vector.extract_strided_slice %49 {offsets = [6, 0, 0], sizes = [1, 8, 8], strides = [1, 1, 1]} : vector<12x8x8xbf16> to vector<1x8x8xbf16>
    %100 = vector.shape_cast %99 : vector<1x8x8xbf16> to vector<8x8xbf16>
    %101 = vector.extract_strided_slice %14 {offsets = [0, 192], sizes = [8, 32], strides = [1, 1]} : vector<8x384xbf16> to vector<8x32xbf16>
    %cst_44 = arith.constant dense<0.000000e+00> : vector<8x32xf32>
    %102 = tpu.matmul %100, %101, %cst_44 {dimension_numbers = #tpu.dot_dimension_numbers<[1], [0], [0], [1], [0, 0, 1, 1], [], []>} : vector<8x8xbf16>, vector<8x32xbf16>, vector<8x32xf32> -> vector<8x32xf32>
    %103 = arith.truncf %102 : vector<8x32xf32> to vector<8x32xbf16>
    %c192 = arith.constant 192 : index
    %c0_45 = arith.constant 0 : index
    %104 = vector.load %arg6[%c192, %c0_45] : memref<384x128xbf16, #tpu.memory_space<vmem>>, vector<32x128xbf16>
    %cst_46 = arith.constant dense<0.000000e+00> : vector<8x128xf32>
    %105 = tpu.matmul %103, %104, %cst_46 {dimension_numbers = #tpu.dot_dimension_numbers<[1], [0], [0], [1], [0, 0, 1, 1], [], []>} : vector<8x32xbf16>, vector<32x128xbf16>, vector<8x128xf32> -> vector<8x128xf32>
    %106 = arith.addf %98, %105 : vector<8x128xf32>
    %107 = vector.extract_strided_slice %49 {offsets = [7, 0, 0], sizes = [1, 8, 8], strides = [1, 1, 1]} : vector<12x8x8xbf16> to vector<1x8x8xbf16>
    %108 = vector.shape_cast %107 : vector<1x8x8xbf16> to vector<8x8xbf16>
    %109 = vector.extract_strided_slice %14 {offsets = [0, 224], sizes = [8, 32], strides = [1, 1]} : vector<8x384xbf16> to vector<8x32xbf16>
    %cst_47 = arith.constant dense<0.000000e+00> : vector<8x32xf32>
    %110 = tpu.matmul %108, %109, %cst_47 {dimension_numbers = #tpu.dot_dimension_numbers<[1], [0], [0], [1], [0, 0, 1, 1], [], []>} : vector<8x8xbf16>, vector<8x32xbf16>, vector<8x32xf32> -> vector<8x32xf32>
    %111 = arith.truncf %110 : vector<8x32xf32> to vector<8x32xbf16>
    %c224 = arith.constant 224 : index
    %c0_48 = arith.constant 0 : index
    %112 = vector.load %arg6[%c224, %c0_48] : memref<384x128xbf16, #tpu.memory_space<vmem>>, vector<32x128xbf16>
    %cst_49 = arith.constant dense<0.000000e+00> : vector<8x128xf32>
    %113 = tpu.matmul %111, %112, %cst_49 {dimension_numbers = #tpu.dot_dimension_numbers<[1], [0], [0], [1], [0, 0, 1, 1], [], []>} : vector<8x32xbf16>, vector<32x128xbf16>, vector<8x128xf32> -> vector<8x128xf32>
    %114 = arith.addf %106, %113 : vector<8x128xf32>
    %115 = vector.extract_strided_slice %49 {offsets = [8, 0, 0], sizes = [1, 8, 8], strides = [1, 1, 1]} : vector<12x8x8xbf16> to vector<1x8x8xbf16>
    %116 = vector.shape_cast %115 : vector<1x8x8xbf16> to vector<8x8xbf16>
    %117 = vector.extract_strided_slice %14 {offsets = [0, 256], sizes = [8, 32], strides = [1, 1]} : vector<8x384xbf16> to vector<8x32xbf16>
    %cst_50 = arith.constant dense<0.000000e+00> : vector<8x32xf32>
    %118 = tpu.matmul %116, %117, %cst_50 {dimension_numbers = #tpu.dot_dimension_numbers<[1], [0], [0], [1], [0, 0, 1, 1], [], []>} : vector<8x8xbf16>, vector<8x32xbf16>, vector<8x32xf32> -> vector<8x32xf32>
    %119 = arith.truncf %118 : vector<8x32xf32> to vector<8x32xbf16>
    %c256 = arith.constant 256 : index
    %c0_51 = arith.constant 0 : index
    %120 = vector.load %arg6[%c256, %c0_51] : memref<384x128xbf16, #tpu.memory_space<vmem>>, vector<32x128xbf16>
    %cst_52 = arith.constant dense<0.000000e+00> : vector<8x128xf32>
    %121 = tpu.matmul %119, %120, %cst_52 {dimension_numbers = #tpu.dot_dimension_numbers<[1], [0], [0], [1], [0, 0, 1, 1], [], []>} : vector<8x32xbf16>, vector<32x128xbf16>, vector<8x128xf32> -> vector<8x128xf32>
    %122 = arith.addf %114, %121 : vector<8x128xf32>
    %123 = vector.extract_strided_slice %49 {offsets = [9, 0, 0], sizes = [1, 8, 8], strides = [1, 1, 1]} : vector<12x8x8xbf16> to vector<1x8x8xbf16>
    %124 = vector.shape_cast %123 : vector<1x8x8xbf16> to vector<8x8xbf16>
    %125 = vector.extract_strided_slice %14 {offsets = [0, 288], sizes = [8, 32], strides = [1, 1]} : vector<8x384xbf16> to vector<8x32xbf16>
    %cst_53 = arith.constant dense<0.000000e+00> : vector<8x32xf32>
    %126 = tpu.matmul %124, %125, %cst_53 {dimension_numbers = #tpu.dot_dimension_numbers<[1], [0], [0], [1], [0, 0, 1, 1], [], []>} : vector<8x8xbf16>, vector<8x32xbf16>, vector<8x32xf32> -> vector<8x32xf32>
    %127 = arith.truncf %126 : vector<8x32xf32> to vector<8x32xbf16>
    %c288 = arith.constant 288 : index
    %c0_54 = arith.constant 0 : index
    %128 = vector.load %arg6[%c288, %c0_54] : memref<384x128xbf16, #tpu.memory_space<vmem>>, vector<32x128xbf16>
    %cst_55 = arith.constant dense<0.000000e+00> : vector<8x128xf32>
    %129 = tpu.matmul %127, %128, %cst_55 {dimension_numbers = #tpu.dot_dimension_numbers<[1], [0], [0], [1], [0, 0, 1, 1], [], []>} : vector<8x32xbf16>, vector<32x128xbf16>, vector<8x128xf32> -> vector<8x128xf32>
    %130 = arith.addf %122, %129 : vector<8x128xf32>
    %131 = vector.extract_strided_slice %49 {offsets = [10, 0, 0], sizes = [1, 8, 8], strides = [1, 1, 1]} : vector<12x8x8xbf16> to vector<1x8x8xbf16>
    %132 = vector.shape_cast %131 : vector<1x8x8xbf16> to vector<8x8xbf16>
    %133 = vector.extract_strided_slice %14 {offsets = [0, 320], sizes = [8, 32], strides = [1, 1]} : vector<8x384xbf16> to vector<8x32xbf16>
    %cst_56 = arith.constant dense<0.000000e+00> : vector<8x32xf32>
    %134 = tpu.matmul %132, %133, %cst_56 {dimension_numbers = #tpu.dot_dimension_numbers<[1], [0], [0], [1], [0, 0, 1, 1], [], []>} : vector<8x8xbf16>, vector<8x32xbf16>, vector<8x32xf32> -> vector<8x32xf32>
    %135 = arith.truncf %134 : vector<8x32xf32> to vector<8x32xbf16>
    %c320 = arith.constant 320 : index
    %c0_57 = arith.constant 0 : index
    %136 = vector.load %arg6[%c320, %c0_57] : memref<384x128xbf16, #tpu.memory_space<vmem>>, vector<32x128xbf16>
    %cst_58 = arith.constant dense<0.000000e+00> : vector<8x128xf32>
    %137 = tpu.matmul %135, %136, %cst_58 {dimension_numbers = #tpu.dot_dimension_numbers<[1], [0], [0], [1], [0, 0, 1, 1], [], []>} : vector<8x32xbf16>, vector<32x128xbf16>, vector<8x128xf32> -> vector<8x128xf32>
    %138 = arith.addf %130, %137 : vector<8x128xf32>
    %139 = vector.extract_strided_slice %49 {offsets = [11, 0, 0], sizes = [1, 8, 8], strides = [1, 1, 1]} : vector<12x8x8xbf16> to vector<1x8x8xbf16>
    %140 = vector.shape_cast %139 : vector<1x8x8xbf16> to vector<8x8xbf16>
    %141 = vector.extract_strided_slice %14 {offsets = [0, 352], sizes = [8, 32], strides = [1, 1]} : vector<8x384xbf16> to vector<8x32xbf16>
    %cst_59 = arith.constant dense<0.000000e+00> : vector<8x32xf32>
    %142 = tpu.matmul %140, %141, %cst_59 {dimension_numbers = #tpu.dot_dimension_numbers<[1], [0], [0], [1], [0, 0, 1, 1], [], []>} : vector<8x8xbf16>, vector<8x32xbf16>, vector<8x32xf32> -> vector<8x32xf32>
    %143 = arith.truncf %142 : vector<8x32xf32> to vector<8x32xbf16>
    %c352 = arith.constant 352 : index
    %c0_60 = arith.constant 0 : index
    %144 = vector.load %arg6[%c352, %c0_60] : memref<384x128xbf16, #tpu.memory_space<vmem>>, vector<32x128xbf16>
    %cst_61 = arith.constant dense<0.000000e+00> : vector<8x128xf32>
    %145 = tpu.matmul %143, %144, %cst_61 {dimension_numbers = #tpu.dot_dimension_numbers<[1], [0], [0], [1], [0, 0, 1, 1], [], []>} : vector<8x32xbf16>, vector<32x128xbf16>, vector<8x128xf32> -> vector<8x128xf32>
    %146 = arith.addf %138, %145 : vector<8x128xf32>
    %c0_62 = arith.constant 0 : index
    %c0_63 = arith.constant 0 : index
    %147 = vector.load %arg7[%c0_62, %c0_63] : memref<1x128xf32, #tpu.memory_space<vmem>>, vector<1x128xf32>
    %148 = vector.broadcast %147 : vector<1x128xf32> to vector<8x128xf32>
    %149 = arith.addf %146, %148 : vector<8x128xf32>
    %cst_64 = arith.constant 0.000000e+00 : f32
    %150 = vector.broadcast %cst_64 : f32 to vector<8x128xf32>
    %151 = arith.maximumf %149, %150 : vector<8x128xf32>
    %c0_65 = arith.constant 0 : index
    %c0_66 = arith.constant 0 : index
    %152 = vector.load %arg8[%c0_65, %c0_66] : memref<8x128xf32, #tpu.memory_space<vmem>>, vector<8x128xf32>
    tpu.vector_store %arg8[%c0_65, %c0_66], %151 {strides = array<i32>} : memref<8x128xf32, #tpu.memory_space<vmem>>, vector<8x128xf32>,
    return
  }
}

</mosaic_0001>

<bundles_post_ra>
// kernel: hetero_graph_conv_forward.1
= control target key start
LH: loop header
LB: loop body
LE: loop exit
PB: predicated region body
PF: predicated region fallthrough
CT: control target
= control target key end

     0   :  { %13 = vsyncpa [#allocation3], 0  ;;  %s3659_s0 = inlined_call_operand.vmem [shape: bf16[8,256], index: 0, kind: input, shape index: {}]   ;;  %s3660_s1 = inlined_call_operand.vmem [shape: bf16[256,96], index: 1, kind: input, shape index: {}]   ;;  %s3661_s2 = inlined_call_operand.vmem [shape: bf16[96,384], index: 2, kind: input, shape index: {}]   ;;  %s3662_s3 = inlined_call_operand.vmem [shape: bf16[12,384], index: 3, kind: input, shape index: {}]   ;;  %s3663_s4 = inlined_call_operand.vmem [shape: bf16[12,384], index: 4, kind: input, shape index: {}]   ;;  %s3664_s5 = inlined_call_operand.vmem [shape: f32[8,8], index: 5, kind: input, shape index: {}]   ;;  %s3665_s6 = inlined_call_operand.vmem [shape: bf16[384,128], index: 6, kind: input, shape index: {}]   ;;  %s3666_s7 = inlined_call_operand.hbm [shape: f32[1,128], index: 7, kind: input, shape index: {}]   ;;  %s3667_s8 = inlined_call_operand.hbm [shape: f32[8,128], index: 8, kind: output, shape index: {}]  }
   0x1   :  { %14 = vsyncpa [#allocation4], 0  ;;  %s2986_s27 = smov [#allocation2]   ;;  %s2938_s9 = scalar_lea.hbm %s3666_s7, 16 }
   0x2   :  { %s35_s28 = sshll.u32 %s2986_s27, 4  ;;  %p2939_p0 = scmp.ne.s32.totalorder %s3666_s7, %s2938_s9  ;;  %s36_s28 = int_to_ptr.vmem [resolvable:$true] %s35_s28 }
   0x3   :  { %p2942_p1 = scmp.lt.u32.totalorder %s2938_s9, %s3666_s7 }
   0x5   :  { %p2944_p2 = pnand %p2942_p1, %p2939_p0 }
   0x7   :  { %2947 = shalt.err (!%p2944_p2)
}
   0x8   :  { %s2948_s14 = scalar_lea.vmem %s36_s28, 16  ;;  %s2952_s15 = scalar_lea.vmem %s36_s28, 32 }
   0x9   :  { %p2949_p3 = scmp.ne.s32.totalorder %s36_s28, %s2948_s14  ;;  %p2953_p4 = scmp.lt.s32.totalorder %s36_s28, %s36_s28 }
   0xa   :  { %p2954_p5 = scmp.lt.s32.totalorder %s2952_s15, %s2948_s14 }
   0xc   :  { %p2955_p6 = por %p2954_p5, %p2953_p4 }
   0xe   :  { %p2956_p7 = pnand %p2955_p6, %p2949_p3 }
  0x10   :  { %2959 = shalt.err (!%p2956_p7)
}
  0x11   :  { %38 = dma.hbm_to_vmem [thread:$0]  %s3666_s7, 16, %s36_s28, [#allocation3]  }
  0x12   :  { %2982 = dma.done.wait [#allocation3], 16  }
  0x13   :  { %2983 = vsyncadd [#allocation3], 4294967280  ;;  %v2816_v0 = vld [vmem:[%s3660_s1 + $0x40] sm:$0xff]   ;;  %v2818_v2 = vld [vmem:[%s3660_s1 + $0x48] sm:$0xff]   ;;  %v2987_v31 = vmov 0   ;;  %v2988_v32 = vmov 0.0  }
  0x14   :  { %v2817_v1 = vld [vmem:[%s3660_s1] sm:$0xff]   ;;  %2509 = vmatprep.subr.bf16.mxu0 %v2816_v0  ;;  %v2819_v3 = vld [vmem:[%s3660_s1 + $0x8] sm:$0xff]   ;;  %v2820_v4 = vld [vmem:[%s3660_s1 + $0x50] sm:$0xff]   ;;  %380 = vmatprep.mubr.bf16.mxu1 %v2987_v31  ;;  %vm344_vm0 = vcmask 785408   ;;  %vm2989_vm1 = vmmov 0   ;;  %vm1089_vm2 = vcmask 1043456   ;;  %v636_v0 = vlaneseq }
  0x15   :  { %2510 = vmatpush3.bf16.msra.mxu0 %v2817_v1  ;;  %v2821_v5 = vld [vmem:[%s3660_s1 + $0x10] sm:$0xff]   ;;  %v2822_v6 = vld [vmem:[%s3660_s1 + $0x58] sm:$0xff]   ;;  %v2824_v8 = vld [vmem:[%s3660_s1 + $0x60] sm:$0xff]   ;;  %v2990_v1 = vmov 1966171168   ;;  %vm915_vm5 = vcmask 64512  }
  0x16   :  { %2511 = vmatprep.subr.bf16.mxu0 %v2818_v2  ;;  %v2823_v7 = vld [vmem:[%s3660_s1 + $0x18] sm:$0xff]   ;;  %v2825_v9 = vld [vmem:[%s3660_s1 + $0x20] sm:$0xff]   ;;  %v2826_v10 = vld [vmem:[%s3660_s1 + $0x68] sm:$0xff]   ;;  %v724_v2 = vunpack.c.l.s4 %v2990_v1  ;;  %s2993_s7 = smov 32  }
  0x17   :  { %v46_v11 = vld [vmem:[%s3659_s0] sm:$0xff]  ;;  %v2837_v15 = vld [vmem:[%s3661_s2 + $0x1c] ss:$12 sps:$4 sm:$0xff]   ;;  %v2828_v17 = vld [vmem:[%s3660_s1 + $0x70] sm:$0xff]   ;;  %s2994_s0 = smov 64  }
  0x18   :  { %v2417_v12 = vcombine.high %v46_v11, %v46_v11  ;;  %v2834_v13 = vld [vmem:[%s3661_s2 + $0x4] ss:$12 sps:$4 sm:$0xff]   ;;  %v2836_v14 = vld [vmem:[%s3661_s2] ss:$12 sps:$4 sm:$0xff]   ;;  %v2830_v20 = vld [vmem:[%s3660_s1 + $0x78] sm:$0xff]   ;;  %v2416_v27 = vcombine.low %v46_v11, %v46_v11 }
  0x19   :  { %2512 = vmatpush3.bf16.msra.mxu0 %v2819_v3  ;;  %v2827_v16 = vld [vmem:[%s3660_s1 + $0x28] sm:$0xff]   ;;  %348 = vmatprep.subr.bf16.mxu1 %v2834_v13  ;;  %v2829_v18 = vld [vmem:[%s3660_s1 + $0x30] sm:$0xff]   ;;  %v2839_v19 = vld [vmem:[%s3661_s2 + $0x18] ss:$12 sps:$4 sm:$0xff]   ;;  %v3213_v3 = vshrl.u32 %v636_v0, 7 }
  0x1a   :  { %2513 = vmatprep.subr.bf16.mxu0 %v2820_v4  ;;  %214 = vmatprep.mubr.bf16.mxu0 %v2417_v12  ;;  %v2840_v21 = vld [vmem:[%s3661_s2 + $0x34] ss:$12 sps:$4 sm:$0xff]   ;;  %v2842_v22 = vld [vmem:[%s3661_s2 + $0x30] ss:$12 sps:$4 sm:$0xff]   ;;  %v2843_v23 = vld [vmem:[%s3661_s2 + $0x4c] ss:$12 sps:$4 sm:$0xff]   ;;  %v725_v4 = vunpack.c.0.s8 %v724_v2 }
  0x1b   :  { %349 = vmatpush1.bf16.msra.mxu1 %v2836_v14  ;;  %v2831_v24 = vld [vmem:[%s3660_s1 + $0x38] sm:$0xff]   ;;  %v2845_v25 = vld [vmem:[%s3661_s2 + $0x48] ss:$12 sps:$4 sm:$0xff]   ;;  %v2846_v26 = vld [vmem:[%s3661_s2 + $0x64] ss:$12 sps:$4 sm:$0xff]  }
  0x1c   :  { %350 = vmatprep.subr.bf16.mxu1 %v2837_v15  ;;  %v2848_v28 = vld [vmem:[%s3661_s2 + $0x60] ss:$12 sps:$4 sm:$0xff]   ;;  %v2849_v29 = vld [vmem:[%s3661_s2 + $0x7c] ss:$12 sps:$4 sm:$0xff]   ;;  %v2851_v30 = vld [vmem:[%s3661_s2 + $0x78] ss:$12 sps:$4 sm:$0xff]  }
  0x1d   :  { %2514 = vmatpush3.bf16.msra.mxu0 %v2821_v5  ;;  %v2852_v39 = vld [vmem:[%s3661_s2 + $0x8] ss:$12 sps:$4 sm:$0xff]   ;;  %v2853_v41 = vld [vmem:[%s3661_s2 + $0x20] ss:$12 sps:$4 sm:$0xff]   ;;  %v2854_v42 = vld [vmem:[%s3661_s2 + $0x38] ss:$12 sps:$4 sm:$0xff]   ;;  %v728_v5 = vsub.s32 %v725_v4, %v3213_v3 }
  0x1e   :  { %2515 = vmatprep.subr.bf16.mxu0 %v2822_v6  ;;  %v2855_v43 = vld [vmem:[%s3661_s2 + $0x50] ss:$12 sps:$4 sm:$0xff]   ;;  %v2856_v44 = vld [vmem:[%s3661_s2 + $0x68] ss:$12 sps:$4 sm:$0xff]   ;;  %v2857_v45 = vld [vmem:[%s3661_s2 + $0x80] ss:$12 sps:$4 sm:$0xff]  }
  0x1f   :  { %351 = vmatpush1.bf16.msra.mxu1 %v2839_v19  ;;  %v2860_v46 = vld [vmem:[%s3662_s3 + $0x4] ss:$12 sps:$4 sm:$0x3f]   ;;  %v2858_v54 = vld [vmem:[%s3662_s3] ss:$12 sps:$4 sm:$0x3f]  }
  0x20   :  { %352 = vmatprep.subr.bf16.mxu1 %v2840_v21  ;;  %v2861_v60 = vld [vmem:[%s3662_s3 + $0x8] ss:$12 sps:$4 sm:$0x3f]   ;;  %v2864_v61 = vld [vmem:[%s3663_s4 + $0x4] ss:$12 sps:$4 sm:$0x3f]  }
  0x21   :  { %2516 = vmatpush3.bf16.msra.mxu0 %v2823_v7  ;;  %v2862_v62 = vld [vmem:[%s3663_s4] ss:$12 sps:$4 sm:$0x3f]   ;;  %v2865_v63 = vld [vmem:[%s3663_s4 + $0x8] ss:$12 sps:$4 sm:$0x3f]  }
  0x22   :  { %2517 = vmatprep.subr.bf16.mxu0 %v2824_v8 }
  0x23   :  { %353 = vmatpush1.bf16.msra.mxu1 %v2842_v22 }
  0x24   :  { %354 = vmatprep.subr.bf16.mxu1 %v2843_v23 }
  0x25   :  { %2518 = vmatpush3.bf16.msra.mxu0 %v2825_v9 }
  0x26   :  { %2519 = vmatprep.subr.bf16.mxu0 %v2826_v10  ;;  %v3217_v10 = vsub.s32 0, %v3213_v3 }
  0x27   :  { %355 = vmatpush1.bf16.msra.mxu1 %v2845_v25 }
  0x28   :  { %356 = vmatprep.subr.bf16.mxu1 %v2846_v26 }
  0x29   :  { %2520 = vmatpush3.bf16.msra.mxu0 %v2827_v16 }
  0x2a   :  { %2521 = vmatprep.subr.bf16.mxu0 %v2828_v17 }
  0x2b   :  { %357 = vmatpush1.bf16.msra.mxu1 %v2848_v28 }
  0x2c   :  { %358 = vmatprep.subr.bf16.mxu1 %v2849_v29 }
  0x2d   :  { %2522 = vmatpush3.bf16.msra.mxu0 %v2829_v18 }
  0x2e   :  { %2523 = vmatprep.subr.bf16.mxu0 %v2830_v20 }
  0x2f   :  { %359 = vmatpush1.bf16.msra.mxu1 %v2851_v30 }
  0x30   :  { %2602 = vmatprep.subr.bf16.mxu1 %v2988_v32 }
  0x31   :  { %2524 = vmatpush3.bf16.msra.mxu0 %v2831_v24 }
  0x34   :  { %215 = vmatmul.mubr.bf16.vlgmr.msra.gmra.mrb[0].mxu0 %v2416_v27 }
  0x35   :  { %484 = vmatprep.mubr.bf16.mxu0 %v2860_v46  ;;  %v666_v46 = vsub.s32 4, %v3213_v3 }
 0x107   :  { %v2525_v33 = vpop.f32.mrb[0].mxu0 }
 0x108   :  { %v2526_v34 = vpop.f32.mrb[1].mxu0 }
 0x109   :  { %v2527_v35 = vadd.f32 %v2526_v34, %v2525_v33  ;;  %v2528_v36 = vpop.f32.mrb[2].mxu0 }
 0x10a   :  { %v2529_v37 = vpop.f32.mrb[3].mxu0 }
 0x10b   :  { %v222_v38 = vmax.f32 %v2527_v35, 0.0 }
 0x10d   :  { %v223_v40 = vpack.c.bf16 %v222_v38, %v222_v38 }
 0x10f   :  { %2452 = vmatmul.mubr.msk.bf16.vlgmr.msra.gmra.mrb[0].mxu1 %vm344_vm0, %v223_v40 }
 0x110   :  { %2603 = vmatpush3.bf16.msra.mxu1 %v2852_v39  ;;  %2614 = vmatprep.mubr.msk.bf16.mxu1 %vm2989_vm1, %v2988_v32 }
 0x111   :  { %2604 = vmatprep.subr.bf16.mxu1 %v2988_v32 }
 0x114   :  { %2605 = vmatpush3.bf16.msra.mxu1 %v2853_v41 }
 0x115   :  { %2606 = vmatprep.subr.bf16.mxu1 %v2988_v32 }
 0x118   :  { %2607 = vmatpush3.bf16.msra.mxu1 %v2854_v42 }
 0x119   :  { %2608 = vmatprep.subr.bf16.mxu1 %v2988_v32 }
 0x11c   :  { %2609 = vmatpush3.bf16.msra.mxu1 %v2855_v43  ;;  %v673_v43 = vsub.s32 5, %v3213_v3 }
 0x11d   :  { %2610 = vmatprep.subr.bf16.mxu1 %v2988_v32 }
 0x120   :  { %2611 = vmatpush3.bf16.msra.mxu1 %v2856_v44  ;;  %v652_v44 = vsub.s32 2, %v3213_v3 }
 0x121   :  { %2612 = vmatprep.subr.bf16.mxu1 %v2988_v32 }
 0x124   :  { %2613 = vmatpush3.bf16.msra.mxu1 %v2857_v45  ;;  %v659_v45 = vsub.s32 3, %v3213_v3 }
 0x125   :  { %2630 = vmatprep.subr.bf16.mxu1 %v2988_v32 }
 0x127   :  { %2615 = vmatmul.mubr.msk.bf16.vlgmr.msra.gmra.mrb[4].mxu1 %vm344_vm0, %v223_v40 }
 0x128   :  { %2632 = vmatprep.mubr.msk.bf16.mxu1 %vm2989_vm1, %v2988_v32 }
 0x1e2   :  { %v382_v47 = vpop.f32.mrb[0].mxu1 }
 0x1e3   :  { %v3174_v48 = vpack.c.bf16 %v382_v47, %v382_v47  ;;  %v384_v49 = vpop.f32.mrb[1].mxu1  ;;  %v680_v47 = vsub.s32 6, %v3213_v3 }
 0x1e4   :  { %v3176_v50 = vpack.c.bf16 %v384_v49, %v384_v49  ;;  %v386_v51 = vpop.f32.mrb[2].mxu1  ;;  %v687_v49 = vsub.s32 7, %v3213_v3 }
 0x1e5   :  { %v387_v52 = vpop.f32.mrb[3].mxu1  ;;  %v1091_v53 = vsel %vm1089_vm2, %v3174_v48, 0 }
 0x1e6   :  { %452 = vmatprep.subr.bf16.mxu0 %v3176_v50  ;;  %2631 = vmatpush3.bf16.msra.mxu1 %v1091_v53 }
 0x1e7   :  { %453 = vmatpush1.bf16.xpose.msra.mxu0 %v3174_v48  ;;  %2636 = vmatprep.subr.bf16.mxu1 %v2988_v32 }
 0x1e8   :  { %2618 = vmatprep.subr.bf16.mxu0 %v2988_v32 }
 0x1ee   :  { %485 = vmatmul.mubr.bf16.vlgmr.msra.gmra.mrb[4].mxu0 %v2858_v54  ;;  %v645_v54 = vsub.s32 1, %v3213_v3  ;;  %v3275_v3 = vld [vmem:[%s3664_s5] sm:$0xff]  ;;  %s2992_s5 = smov 96  }
 0x1ef   :  { %2620 = vmatprep.mubr.msk.bf16.mxu0 %vm2989_vm1, %v2988_v32  ;;  %vm44_vm3 = vcmp.gt.f32.partialorder %v3275_v3, 0.0 }
 0x1fa   :  { %v423_v55 = vpop.f32.mrb[4].mxu1 }
 0x1fb   :  { %v3189_v56 = vpack.c.bf16 %v423_v55, %v423_v55  ;;  %v2616_v57 = vpop.f32.mrb[5].mxu1 }
 0x1fc   :  { %v426_v58 = vpop.f32.mrb[6].mxu1 }
 0x1fd   :  { %v2617_v59 = vpop.f32.mrb[7].mxu1  ;;  %2619 = vmatpush3.bf16.xpose.msra.mxu0 %v3189_v56 }
 0x1fe   :  { %554 = vmatprep.subr.bf16.mxu0 %v3176_v50 }
 0x204   :  { %2621 = vmatmul.mubr.bf16.vlgmr.msra.gmra.mrb[4].mxu0 %v2861_v60 }
 0x205   :  { %555 = vmatpush1.bf16.xpose.msra.mxu0 %v3174_v48  ;;  %586 = vmatprep.mubr.bf16.mxu0 %v2864_v61 }
 0x206   :  { %2624 = vmatprep.subr.bf16.mxu0 %v2988_v32 }
 0x20c   :  { %587 = vmatmul.mubr.bf16.vlgmr.msra.gmra.mrb[8].mxu0 %v2862_v62 }
 0x20d   :  { %2625 = vmatpush3.bf16.xpose.msra.mxu0 %v3189_v56  ;;  %2626 = vmatprep.mubr.msk.bf16.mxu0 %vm2989_vm1, %v2988_v32 }
 0x20e   :  { %2642 = vmatprep.subr.bf16.mxu0 %v2988_v32 }
 0x218   :  { %2627 = vmatmul.mubr.bf16.vlgmr.msra.gmra.mrb[8].mxu0 %v2865_v63 }
 0x219   :  { %2646 = vmatprep.mubr.msk.bf16.mxu0 %vm2989_vm1, %v2988_v32 }
 0x2d7   :  { %v527_v6 = vpop.f32.mrb[4].mxu0 }
 0x2d8   :  { %v722_v7 = vcombine.high %v527_v6, %v527_v6  ;;  %v729_v8 = vrot.slane %v527_v6, %v728_v5  ;;  %v2622_v9 = vpop.f32.mrb[5].mxu0 }
 0x2d9   :  { %v530_v11 = vpop.f32.mrb[6].mxu0  ;;  %v2991_v9 = vmov -1e+30  }
 0x2da   :  { %v736_v12 = vrot.slane %v722_v7, %v728_v5  ;;  %v737_v13 = vcombine.high %v729_v8, %v729_v8  ;;  %v745_v14 = vrot.slane %v729_v8, %v728_v5  ;;  %v777_v15 = vrot.slane %v530_v11, %v728_v5  ;;  %v2623_v16 = vpop.f32.mrb[7].mxu0 }
 0x2db   :  { %v3280_v11 = vsel %vm44_vm3, 0.0, %v2991_v9 }
 0x2dc   :  { %v738_v17 = vcombine.high %v736_v12, %v736_v12  ;;  %v778_v18 = vcombine.high %v777_v15, %v777_v15  ;;  %v3219_v19 = vrot.slane %v777_v15, %v728_v5  ;;  %v798_v20 = vrot.slane %v745_v14, %v3217_v10 }
 0x2dd   :  { %v759_v21 = vrot.slane %v737_v13, %v728_v5  ;;  %v767_v22 = vcombine.high %v745_v14, %v745_v14  ;;  %v3222_v23 = vrot.slane %v736_v12, %v728_v5 }
 0x2de   :  { %v3224_v24 = vrot.slane %v738_v17, %v728_v5  ;;  %v830_v25 = vrot.slane %v3219_v19, %v3217_v10  ;;  %v3228_v26 = vrot.slane %v778_v18, %v728_v5  ;;  %v793_v27 = vcombine.high %v3219_v19, %v3219_v19 }
 0x2df   :  { %v802_v28 = vrot.slane %v759_v21, %v3217_v10  ;;  %v3234_v29 = vrot.slane %v767_v22, %v3217_v10  ;;  %v769_v30 = vcombine.high %v759_v21, %v759_v21  ;;  %v814_v31 = vrot.slane %v3222_v23, %v3217_v10 }
 0x2e0   :  { %v818_v33 = vrot.slane %v3224_v24, %v3217_v10  ;;  %v768_v34 = vcombine.high %v3222_v23, %v3222_v23  ;;  %v770_v35 = vcombine.high %v3224_v24, %v3224_v24  ;;  %v834_v36 = vrot.slane %v3228_v26, %v3217_v10 }
 0x2e1   :  { %v3247_v37 = vrot.slane %v769_v30, %v3217_v10  ;;  %v3250_v38 = vrot.slane %v793_v27, %v3217_v10  ;;  %v794_v39 = vcombine.high %v3228_v26, %v3228_v26 }
 0x2e2   :  { %v3255_v40 = vrot.slane %v768_v34, %v3217_v10  ;;  %v3258_v41 = vrot.slane %v770_v35, %v3217_v10 }
 0x2e3   :  { %v3261_v42 = vrot.slane %v794_v39, %v3217_v10 }
 0x2eb   :  { %v629_v51 = vpop.f32.mrb[8].mxu0 }
 0x2ec   :  { %v2628_v52 = vpop.f32.mrb[9].mxu0  ;;  %v639_v53 = vrot.slane %v629_v51, %v3217_v10  ;;  %v674_v55 = vrot.slane %v629_v51, %v673_v43  ;;  %v653_v57 = vrot.slane %v629_v51, %v652_v44  ;;  %v660_v59 = vrot.slane %v629_v51, %v659_v45 }
 0x2ed   :  { %v632_v58 = vpop.f32.mrb[10].mxu0  ;;  %v667_v60 = vrot.slane %v629_v51, %v666_v46  ;;  %v681_v61 = vrot.slane %v629_v51, %v680_v47  ;;  %v688_v62 = vrot.slane %v629_v51, %v687_v49  ;;  %v646_v5 = vrot.slane %v629_v51, %v645_v54 }
 0x2ee   :  { %641 = vbcast.lane.b32.xlu0 %v639_v53, 256  ;;  %v2629_v63 = vpop.f32.mrb[11].mxu0  ;;  %v695_v0 = vrot.slane %v632_v58, %v3217_v10  ;;  %v702_v1 = vrot.slane %v632_v58, %v645_v54  ;;  %v709_v2 = vrot.slane %v632_v58, %v652_v44  ;;  %v716_v4 = vrot.slane %v632_v58, %v659_v45 }
 0x2f2   :  { %648 = vbcast.lane.b32.xlu0 %v646_v5, 256 }
 0x360   :  { %v642_v6 = vpop.permute.xlu0 %641 }
 0x361   :  { %v855_v7 = vadd.f32 %v798_v20, %v642_v6 }
 0x363   :  { %v879_v8 = vmul.f32 0.2, %v855_v7  ;;  %vm867_vm4 = vcmp.ge.f32.partialorder %v855_v7, 0.0 }
 0x364   :  { %v649_v12 = vpop.permute.xlu0 %648 }
 0x365   :  { %v856_v13 = vadd.f32 %v802_v28, %v649_v12  ;;  %v891_v14 = vsel %vm867_vm4, %v855_v7, %v879_v8  ;;  %vm1204_vm4 = vcmask 261120  }
 0x366   :  { %v903_v15 = vadd.f32 %v891_v14, %v3280_v11 }
 0x367   :  { %vm868_vm6 = vcmp.ge.f32.partialorder %v856_v13, 0.0  ;;  %v880_v16 = vmul.f32 0.2, %v856_v13 }
 0x368   :  { %v916_v17 = vsel %vm915_vm5, %v903_v15, -inf }
 0x369   :  { %917 = vmax.xlane.f32.xlu1 %v916_v17  ;;  %v892_v18 = vsel %vm868_vm6, %v856_v13, %v880_v16 }
 0x36a   :  { %v904_v20 = vadd.f32 %v892_v18, %v3280_v11 }
 0x36c   :  { %v919_v21 = vsel %vm915_vm5, %v904_v20, -inf }
 0x36d   :  { %920 = vmax.xlane.f32.xlu1 %v919_v21 }
 0x3f6   :  { %v918_v22 = vpop.xlane.xlu1 %917 }
 0x3f7   :  { %v952_v27 = vsub.f32 %v903_v15, %v918_v22 }
 0x3f9   :  { %v964_v30 = vmul.f32 1.442695, %v952_v27 }
 0x3fa   :  { %v921_v34 = vpop.xlane.xlu1 %920 }
 0x3fb   :  { %2890 = vpow2.f32 %v964_v30  ;;  %v953_v28 = vsub.f32 %v904_v20, %v921_v34 }
 0x3fd   :  { %v966_v35 = vmul.f32 1.442695, %v953_v28 }
 0x3ff   :  { %2892 = vpow2.f32 %v966_v35 }
 0x405   :  { %v2891_v39 = vpop.eup %2890 }
 0x406   :  { %v990_v43 = vsel %vm44_vm3, %v2891_v39, 0.0 }
 0x407   :  { %v1002_v44 = vsel %vm915_vm5, %v990_v43, 0.0 }
 0x408   :  { %1003 = vadd.xlane.f32.xlu0 %v1002_v44 }
 0x409   :  { %v2893_v45 = vpop.eup %2892 }
 0x40a   :  { %v991_v46 = vsel %vm44_vm3, %v2893_v45, 0.0 }
 0x40b   :  { %v1005_v47 = vsel %vm915_vm5, %v991_v46, 0.0 }
 0x40c   :  { %1006 = vadd.xlane.f32.xlu1 %v1005_v47 }
 0x41d   :  { %1139 = vrot.lane.b32.xlu1 %v3174_v48, %s2992_s5 }
 0x41e   :  { %676 = vbcast.lane.b32.xlu0 %v674_v55, 256 }
 0x421   :  { %655 = vbcast.lane.b32.xlu1 %v653_v57, 256 }
 0x425   :  { %662 = vbcast.lane.b32.xlu1 %v660_v59, 256 }
 0x429   :  { %669 = vbcast.lane.b32.xlu1 %v667_v60, 256 }
 0x42d   :  { %683 = vbcast.lane.b32.xlu1 %v681_v61, 256 }
 0x431   :  { %690 = vbcast.lane.b32.xlu1 %v688_v62, 256 }
 0x435   :  { %697 = vbcast.lane.b32.xlu1 %v695_v0, 256 }
 0x439   :  { %704 = vbcast.lane.b32.xlu1 %v702_v1, 256 }
 0x43d   :  { %711 = vbcast.lane.b32.xlu1 %v709_v2, 256 }
 0x441   :  { %718 = vbcast.lane.b32.xlu1 %v716_v4, 256 }
 0x495   :  { %v1004_v49 = vpop.xlane.xlu0 %1003 }
 0x496   :  { %v1038_v51 = vmax.f32 %v1004_v49, 1e-30 }
 0x498   :  { %2894 = vrcp.f32 %v1038_v51 }
 0x499   :  { %v1007_v52 = vpop.xlane.xlu1 %1006  ;;  %v677_v59 = vpop.permute.xlu0 %676 }
 0x49a   :  { %v1039_v53 = vmax.f32 %v1007_v52, 1e-30  ;;  %v860_v1 = vadd.f32 %v818_v33, %v677_v59 }
 0x49c   :  { %2896 = vrcp.f32 %v1039_v53  ;;  %v884_v33 = vmul.f32 0.2, %v860_v1  ;;  %vm872_vm9 = vcmp.ge.f32.partialorder %v860_v1, 0.0 }
 0x49d   :  { %v1140_v54 = vpop.permute.xlu1 %1139 }
 0x49e   :  { %v1145_v5 = vsel %vm1089_vm2, %v1140_v54, 0  ;;  %v896_v20 = vsel %vm872_vm9, %v860_v1, %v884_v33 }
 0x49f   :  { %v3327_v27 = vadd.f32 %v896_v20, %v3280_v11 }
 0x4a1   :  { %v656_v58 = vpop.permute.xlu1 %655  ;;  %v931_v35 = vsel %vm915_vm5, %v3327_v27, -inf }
 0x4a2   :  { %v2895_v63 = vpop.eup %2894  ;;  %v857_v55 = vadd.f32 %v3234_v29, %v656_v58 }
 0x4a3   :  { %v1062_v57 = vmul.f32 %v2895_v63, %v990_v43 }
 0x4a4   :  { %vm869_vm7 = vcmp.ge.f32.partialorder %v857_v55, 0.0  ;;  %v881_v60 = vmul.f32 0.2, %v857_v55 }
 0x4a5   :  { %v663_v61 = vpop.permute.xlu1 %662  ;;  %v1074_v62 = vpack.c.bf16 %v1062_v57, %v1062_v57 }
 0x4a6   :  { %v2897_v0 = vpop.eup %2896  ;;  %v858_v2 = vadd.f32 %v3247_v37, %v663_v61  ;;  %v893_v4 = vsel %vm869_vm7, %v857_v55, %v881_v60 }
 0x4a7   :  { %2633 = vmatmul.mubr.msk.bf16.vlgmr.msra.gmra.mrb[8].mxu1 %vm915_vm5, %v1074_v62  ;;  %v3302_v29 = vadd.f32 %v893_v4, %v3280_v11  ;;  %v1063_v7 = vmul.f32 %v2897_v0, %v991_v46 }
 0x4a8   :  { %vm870_vm8 = vcmp.ge.f32.partialorder %v858_v2, 0.0  ;;  %v882_v6 = vmul.f32 0.2, %v858_v2  ;;  %2637 = vmatpush3.bf16.msra.mxu1 %v1145_v5  ;;  %2638 = vmatprep.mubr.msk.bf16.mxu1 %vm2989_vm1, %v2988_v32 }
 0x4a9   :  { %v670_v8 = vpop.permute.xlu1 %669  ;;  %v922_v24 = vsel %vm915_vm5, %v3302_v29, -inf  ;;  %2650 = vmatprep.subr.bf16.mxu1 %v2988_v32  ;;  %v1075_v16 = vpack.c.bf16 %v1063_v7, %v1063_v7 }
 0x4aa   :  { %v859_v37 = vadd.f32 %v814_v31, %v670_v8  ;;  %923 = vmax.xlane.f32.xlu0 %v922_v24  ;;  %v894_v9 = vsel %vm870_vm8, %v858_v2, %v882_v6  ;;  %v2868_v2 = vld [vmem:[%s3665_s6 + $0x10] sm:$0xff]  }
 0x4ab   :  { %v3313_v12 = vadd.f32 %v894_v9, %v3280_v11  ;;  %2643 = vmatpush3.bf16.msra.mxu0 %v2868_v2 }
 0x4ac   :  { %vm871_vm10 = vcmp.ge.f32.partialorder %v859_v37, 0.0  ;;  %v883_v13 = vmul.f32 0.2, %v859_v37  ;;  %2644 = vmatprep.subr.bf16.mxu0 %v2988_v32 }
 0x4ad   :  { %v684_v14 = vpop.permute.xlu1 %683  ;;  %v925_v15 = vsel %vm915_vm5, %v3313_v12, -inf }
 0x4ae   :  { %v861_v17 = vadd.f32 %v3255_v40, %v684_v14  ;;  %926 = vmax.xlane.f32.xlu1 %v925_v15  ;;  %v895_v18 = vsel %vm871_vm10, %v859_v37, %v883_v13 }
 0x4af   :  { %2639 = vmatmul.mubr.msk.bf16.vlgmr.msra.gmra.mrb[12].mxu1 %vm915_vm5, %v1075_v16  ;;  %v3320_v23 = vadd.f32 %v895_v18, %v3280_v11 }
 0x4b0   :  { %vm873_vm11 = vcmp.ge.f32.partialorder %v861_v17, 0.0  ;;  %v885_v31 = vmul.f32 0.2, %v861_v17  ;;  %2654 = vmatprep.mubr.msk.bf16.mxu1 %vm2989_vm1, %v2988_v32 }
 0x4b1   :  { %v691_v21 = vpop.permute.xlu1 %690  ;;  %v928_v22 = vsel %vm915_vm5, %v3320_v23, -inf }
 0x4b2   :  { %v862_v40 = vadd.f32 %v3258_v41, %v691_v21  ;;  %929 = vmax.xlane.f32.xlu0 %v928_v22  ;;  %v897_v30 = vsel %vm873_vm11, %v861_v17, %v885_v31 }
 0x4b3   :  { %v3333_v39 = vadd.f32 %v897_v30, %v3280_v11 }
 0x4b4   :  { %vm874_vm12 = vcmp.ge.f32.partialorder %v862_v40, 0.0  ;;  %v886_v34 = vmul.f32 0.2, %v862_v40 }
 0x4b5   :  { %v698_v28 = vpop.permute.xlu1 %697  ;;  %v934_v47 = vsel %vm915_vm5, %v3333_v39, -inf }
 0x4b6   :  { %v863_v43 = vadd.f32 %v830_v25, %v698_v28  ;;  %932 = vmax.xlane.f32.xlu0 %v931_v35  ;;  %v898_v44 = vsel %vm874_vm12, %v862_v40, %v886_v34 }
 0x4b7   :  { %v3339_v45 = vadd.f32 %v898_v44, %v3280_v11 }
 0x4b8   :  { %vm875_vm13 = vcmp.ge.f32.partialorder %v863_v43, 0.0  ;;  %v887_v41 = vmul.f32 0.2, %v863_v43 }
 0x4b9   :  { %v705_v46 = vpop.permute.xlu1 %704  ;;  %v937_v49 = vsel %vm915_vm5, %v3339_v45, -inf }
 0x4ba   :  { %v864_v51 = vadd.f32 %v834_v36, %v705_v46  ;;  %935 = vmax.xlane.f32.xlu0 %v934_v47  ;;  %938 = vmax.xlane.f32.xlu1 %v937_v49  ;;  %v899_v19 = vsel %vm875_vm13, %v863_v43, %v887_v41 }
 0x4bb   :  { %v3349_v25 = vadd.f32 %v899_v19, %v3280_v11 }
 0x4bc   :  { %vm876_vm14 = vcmp.ge.f32.partialorder %v864_v51, 0.0  ;;  %v888_v52 = vmul.f32 0.2, %v864_v51 }
 0x4bd   :  { %v712_v53 = vpop.permute.xlu1 %711  ;;  %v940_v54 = vsel %vm915_vm5, %v3349_v25, -inf }
 0x4be   :  { %v865_v58 = vadd.f32 %v3250_v38, %v712_v53  ;;  %941 = vmax.xlane.f32.xlu0 %v940_v54  ;;  %v900_v63 = vsel %vm876_vm14, %v864_v51, %v888_v52 }
 0x4bf   :  { %v3355_v55 = vadd.f32 %v900_v63, %v3280_v11 }
 0x4c0   :  { %vm877_vm15 = vcmp.ge.f32.partialorder %v865_v58, 0.0  ;;  %v889_v10 = vmul.f32 0.2, %v865_v58 }
 0x4c1   :  { %v719_v26 = vpop.permute.xlu1 %718  ;;  %v943_v36 = vsel %vm915_vm5, %v3355_v55, -inf }
 0x4c2   :  { %v866_v57 = vadd.f32 %v3261_v42, %v719_v26  ;;  %944 = vmax.xlane.f32.xlu1 %v943_v36  ;;  %v901_v59 = vsel %vm877_vm15, %v865_v58, %v889_v10  ;;  %v2866_v42 = vld [vmem:[%s3665_s6] sm:$0xff]  }
 0x4c3   :  { %v3361_v60 = vadd.f32 %v901_v59, %v3280_v11  ;;  %2651 = vmatpush3.bf16.msra.mxu1 %v2866_v42 }
 0x4c4   :  { %vm878_vm0 = vcmp.ge.f32.partialorder %v866_v57, 0.0  ;;  %v890_v38 = vmul.f32 0.2, %v866_v57  ;;  %2652 = vmatprep.subr.bf16.mxu1 %v2988_v32 }
 0x4c5   :  { %v946_v61 = vsel %vm915_vm5, %v3361_v60, -inf }
 0x4c6   :  { %947 = vmax.xlane.f32.xlu0 %v946_v61  ;;  %v902_v62 = vsel %vm878_vm0, %v866_v57, %v890_v38 }
 0x4c7   :  { %v3366_v0 = vadd.f32 %v902_v62, %v3280_v11  ;;  %v2867_v11 = vld [vmem:[%s3665_s6 + $0x8] sm:$0xff]  }
 0x4c8   :  { %2653 = vmatpush3.bf16.msra.mxu1 %v2867_v11 }
 0x4c9   :  { %v949_v1 = vsel %vm915_vm5, %v3366_v0, -inf  ;;  %2664 = vmatprep.subr.bf16.mxu1 %v2988_v32 }
 0x4ca   :  { %950 = vmax.xlane.f32.xlu1 %v949_v1 }
 0x4db   :  { %1412 = vrot.lane.b32.xlu1 %v3174_v48, %s2993_s7 }
 0x4dc   :  { %1303 = vrot.lane.b32.xlu0 %v3174_v48, %s2994_s0  ;;  %v2869_v48 = vld [vmem:[%s3665_s6 + $0x18] sm:$0xff]  }
 0x4dd   :  { %2645 = vmatpush3.bf16.msra.mxu0 %v2869_v48 }
 0x4de   :  { %2658 = vmatprep.subr.bf16.mxu0 %v2988_v32 }
 0x537   :  { %v924_v4 = vpop.xlane.xlu0 %923 }
 0x538   :  { %v954_v5 = vsub.f32 %v3302_v29, %v924_v4 }
 0x53a   :  { %v968_v6 = vmul.f32 1.442695, %v954_v5 }
 0x53b   :  { %v927_v7 = vpop.xlane.xlu1 %926 }
 0x53c   :  { %2898 = vpow2.f32 %v968_v6  ;;  %v955_v8 = vsub.f32 %v3313_v12, %v927_v7 }
 0x53e   :  { %v970_v24 = vmul.f32 1.442695, %v955_v8 }
 0x53f   :  { %v930_v33 = vpop.xlane.xlu0 %929 }
 0x540   :  { %2900 = vpow2.f32 %v970_v24  ;;  %v956_v37 = vsub.f32 %v3320_v23, %v930_v33 }
 0x542   :  { %v972_v9 = vmul.f32 1.442695, %v956_v37 }
 0x543   :  { %v933_v13 = vpop.xlane.xlu0 %932 }
 0x544   :  { %2902 = vpow2.f32 %v972_v9  ;;  %v957_v14 = vsub.f32 %v3327_v27, %v933_v13 }
 0x546   :  { %v2899_v15 = vpop.eup %2898  ;;  %v974_v16 = vmul.f32 1.442695, %v957_v14 }
 0x547   :  { %v936_v17 = vpop.xlane.xlu0 %935  ;;  %v939_v18 = vpop.xlane.xlu1 %938  ;;  %v3396_v29 = vsel %vm44_vm3, %v2899_v15, 0.0 }
 0x548   :  { %2904 = vpow2.f32 %v974_v16  ;;  %v958_v12 = vsub.f32 %v3333_v39, %v936_v17  ;;  %v959_v20 = vsub.f32 %v3339_v45, %v939_v18  ;;  %v1008_v23 = vsel %vm915_vm5, %v3396_v29, 0.0 }
 0x549   :  { %1009 = vadd.xlane.f32.xlu0 %v1008_v23 }
 0x54a   :  { %v2901_v31 = vpop.eup %2900  ;;  %v976_v21 = vmul.f32 1.442695, %v958_v12  ;;  %v978_v22 = vmul.f32 1.442695, %v959_v20  ;;  %v2870_v20 = vld [vmem:[%s3665_s6 + $0x20] sm:$0xff]  }
 0x54b   :  { %v3404_v27 = vsel %vm44_vm3, %v2901_v31, 0.0  ;;  %v942_v51 = vpop.xlane.xlu0 %941 }
 0x54c   :  { %2906 = vpow2.f32 %v976_v21  ;;  %v1011_v40 = vsel %vm915_vm5, %v3404_v27, 0.0  ;;  %v960_v53 = vsub.f32 %v3349_v25, %v942_v51  ;;  %v1525_v51 = vsel %vm1089_vm2, %v3176_v50, 0 }
 0x54d   :  { %2908 = vpow2.f32 %v978_v22  ;;  %1012 = vadd.xlane.f32.xlu1 %v1011_v40 }
 0x54e   :  { %v2903_v30 = vpop.eup %2902  ;;  %v980_v57 = vmul.f32 1.442695, %v960_v53 }
 0x54f   :  { %v3410_v34 = vsel %vm44_vm3, %v2903_v30, 0.0  ;;  %v945_v54 = vpop.xlane.xlu1 %944 }
 0x550   :  { %v1014_v28 = vsel %vm915_vm5, %v3410_v34, 0.0  ;;  %v961_v59 = vsub.f32 %v3355_v55, %v945_v54 }
 0x551   :  { %1015 = vadd.xlane.f32.xlu0 %v1014_v28 }
 0x552   :  { %v2905_v35 = vpop.eup %2904  ;;  %v982_v25 = vmul.f32 1.442695, %v961_v59 }
 0x553   :  { %v3416_v39 = vsel %vm44_vm3, %v2905_v35, 0.0  ;;  %v948_v19 = vpop.xlane.xlu0 %947 }
 0x554   :  { %v1017_v43 = vsel %vm915_vm5, %v3416_v39, 0.0  ;;  %v962_v52 = vsub.f32 %v3361_v60, %v948_v19 }
 0x555   :  { %1018 = vadd.xlane.f32.xlu1 %v1017_v43 }
 0x556   :  { %v2907_v44 = vpop.eup %2906  ;;  %v984_v63 = vmul.f32 1.442695, %v962_v52 }
 0x557   :  { %v2909_v45 = vpop.eup %2908  ;;  %v3422_v41 = vsel %vm44_vm3, %v2907_v44, 0.0  ;;  %v951_v61 = vpop.xlane.xlu1 %950 }
 0x558   :  { %v1020_v46 = vsel %vm915_vm5, %v3422_v41, 0.0  ;;  %v3428_v47 = vsel %vm44_vm3, %v2909_v45, 0.0  ;;  %2910 = vpow2.f32 %v984_v63  ;;  %v963_v60 = vsub.f32 %v3366_v0, %v951_v61  ;;  %v1304_v62 = vpop.permute.xlu0 %1303 }
 0x559   :  { %1021 = vadd.xlane.f32.xlu1 %v1020_v46  ;;  %v1023_v49 = vsel %vm915_vm5, %v3428_v47, 0.0  ;;  %2912 = vpow2.f32 %v980_v57  ;;  %v1309_v55 = vsel %vm1089_vm2, %v1304_v62, 0 }
 0x55a   :  { %1024 = vadd.xlane.f32.xlu0 %v1023_v49  ;;  %2914 = vpow2.f32 %v982_v25  ;;  %v986_v48 = vmul.f32 1.442695, %v963_v60 }
 0x55b   :  { %v1413_v16 = vpop.permute.xlu1 %1412 }
 0x55c   :  { %2916 = vpow2.f32 %v986_v48  ;;  %v1418_v35 = vsel %vm1089_vm2, %v1413_v16, 0 }
 0x562   :  { %v2911_v5 = vpop.eup %2910 }
 0x563   :  { %v2913_v0 = vpop.eup %2912  ;;  %v3452_v6 = vsel %vm44_vm3, %v2911_v5, 0.0 }
 0x564   :  { %v3456_v7 = vsel %vm44_vm3, %v2913_v0, 0.0  ;;  %v2915_v8 = vpop.eup %2914  ;;  %v1032_v24 = vsel %vm915_vm5, %v3452_v6, 0.0 }
 0x565   :  { %v1026_v33 = vsel %vm915_vm5, %v3456_v7, 0.0  ;;  %v3464_v37 = vsel %vm44_vm3, %v2915_v8, 0.0 }
 0x566   :  { %v2917_v9 = vpop.eup %2916  ;;  %v1029_v13 = vsel %vm915_vm5, %v3464_v37, 0.0 }
 0x567   :  { %v3470_v14 = vsel %vm44_vm3, %v2917_v9, 0.0 }
 0x568   :  { %v1035_v15 = vsel %vm915_vm5, %v3470_v14, 0.0 }
 0x56a   :  { %1738 = vrot.lane.b32.xlu1 %v3176_v50, %s2994_s0 }
 0x56e   :  { %1847 = vrot.lane.b32.xlu1 %v3176_v50, %s2993_s7 }
 0x570   :  { %1629 = vrot.lane.b32.xlu0 %v3176_v50, %s2992_s5 }
 0x57a   :  { %v1127_v58 = vpop.f32.mrb[8].mxu1 }
 0x57b   :  { %v1133_v10 = vpack.c.bf16 %v1127_v58, %v1127_v58  ;;  %v2634_v26 = vpop.f32.mrb[9].mxu1 }
 0x57c   :  { %v1130_v36 = vpop.f32.mrb[10].mxu1 }
 0x57d   :  { %v2635_v38 = vpop.f32.mrb[11].mxu1  ;;  %2655 = vmatmul.mubr.msk.bf16.vlgmr.msra.gmra.mrb[16].mxu1 %vm1204_vm4, %v1133_v10 }
 0x57e   :  { %2668 = vmatprep.mubr.msk.bf16.mxu1 %vm2989_vm1, %v2988_v32  ;;  %2665 = vmatpush3.bf16.msra.mxu1 %v2870_v20 }
 0x57f   :  { %2666 = vmatprep.subr.bf16.mxu1 %v2988_v32 }
 0x582   :  { %v1181_v1 = vpop.f32.mrb[12].mxu1 }
 0x583   :  { %v1187_v42 = vpack.c.bf16 %v1181_v1, %v1181_v1  ;;  %v2640_v11 = vpop.f32.mrb[13].mxu1 }
 0x584   :  { %v1184_v2 = vpop.f32.mrb[14].mxu1 }
 0x585   :  { %v2641_v4 = vpop.f32.mrb[15].mxu1  ;;  %2647 = vmatmul.mubr.msk.bf16.vlgmr.msra.gmra.mrb[12].mxu0 %vm1204_vm4, %v1187_v42 }
 0x586   :  { %2659 = vmatpush3.bf16.msra.mxu0 %v1309_v55  ;;  %2660 = vmatprep.mubr.msk.bf16.mxu0 %vm2989_vm1, %v2988_v32 }
 0x587   :  { %2672 = vmatprep.subr.bf16.mxu0 %v2988_v32 }
 0x58f   :  { %1033 = vadd.xlane.f32.xlu0 %v1032_v24 }
 0x592   :  { %1027 = vadd.xlane.f32.xlu1 %v1026_v33 }
 0x596   :  { %1030 = vadd.xlane.f32.xlu1 %v1029_v13 }
 0x59a   :  { %1036 = vadd.xlane.f32.xlu1 %v1035_v15 }
 0x5a5   :  { %2064 = vrot.lane.b32.xlu0 %v3189_v56, %s2992_s5 }
 0x5a9   :  { %2282 = vrot.lane.b32.xlu0 %v3189_v56, %s2993_s7 }
 0x5ab   :  { %2173 = vrot.lane.b32.xlu1 %v3189_v56, %s2994_s0 }
 0x5d6   :  { %v1010_v17 = vpop.xlane.xlu0 %1009 }
 0x5d7   :  { %v1040_v18 = vmax.f32 %v1010_v17, 1e-30 }
 0x5d9   :  { %2918 = vrcp.f32 %v1040_v18 }
 0x5da   :  { %v1013_v3 = vpop.xlane.xlu1 %1012 }
 0x5db   :  { %v1041_v12 = vmax.f32 %v1013_v3, 1e-30 }
 0x5dd   :  { %2920 = vrcp.f32 %v1041_v12 }
 0x5de   :  { %v1016_v23 = vpop.xlane.xlu0 %1015 }
 0x5df   :  { %v1042_v31 = vmax.f32 %v1016_v23, 1e-30 }
 0x5e1   :  { %2922 = vrcp.f32 %v1042_v31 }
 0x5e2   :  { %v1019_v40 = vpop.xlane.xlu1 %1018 }
 0x5e3   :  { %v2919_v21 = vpop.eup %2918  ;;  %v1043_v43 = vmax.f32 %v1019_v40, 1e-30 }
 0x5e4   :  { %v1064_v22 = vmul.f32 %v2919_v21, %v3396_v29 }
 0x5e5   :  { %2924 = vrcp.f32 %v1043_v43 }
 0x5e6   :  { %v1076_v30 = vpack.c.bf16 %v1064_v22, %v1064_v22  ;;  %v1022_v45 = vpop.xlane.xlu1 %1021 }
 0x5e7   :  { %v2921_v28 = vpop.eup %2920  ;;  %v1025_v49 = vpop.xlane.xlu0 %1024  ;;  %v1044_v19 = vmax.f32 %v1022_v45, 1e-30  ;;  %v2872_v45 = vld [vmem:[%s3665_s6 + $0x30] sm:$0xff]  }
 0x5e8   :  { %2661 = vmatmul.mubr.msk.bf16.vlgmr.msra.gmra.mrb[16].mxu0 %vm915_vm5, %v1076_v30  ;;  %v1065_v44 = vmul.f32 %v2921_v28, %v3404_v27  ;;  %v1045_v63 = vmax.f32 %v1025_v49, 1e-30 }
 0x5e9   :  { %2673 = vmatpush3.bf16.msra.mxu0 %v1418_v35  ;;  %2674 = vmatprep.mubr.msk.bf16.mxu0 %vm2989_vm1, %v2988_v32  ;;  %2926 = vrcp.f32 %v1044_v19 }
 0x5ea   :  { %2686 = vmatprep.subr.bf16.mxu0 %v2988_v32  ;;  %v1077_v29 = vpack.c.bf16 %v1065_v44, %v1065_v44  ;;  %2928 = vrcp.f32 %v1045_v63  ;;  %v2875_v63 = vld [vmem:[%s3665_s6 + $0x48] sm:$0xff]  }
 0x5eb   :  { %v2923_v46 = vpop.eup %2922  ;;  %v1630_v27 = vpop.permute.xlu0 %1629 }
 0x5ec   :  { %v1066_v52 = vmul.f32 %v2923_v46, %v3410_v34  ;;  %v1635_v58 = vsel %vm1089_vm2, %v1630_v27, 0  ;;  %v1739_v34 = vpop.permute.xlu1 %1738 }
 0x5ed   :  { %v1744_v36 = vsel %vm1089_vm2, %v1739_v34, 0  ;;  %v2876_v34 = vld [vmem:[%s3665_s6 + $0x50] sm:$0xff]  }
 0x5ee   :  { %v1078_v53 = vpack.c.bf16 %v1066_v52, %v1066_v52  ;;  %v2874_v52 = vld [vmem:[%s3665_s6 + $0x40] sm:$0xff]  }
 0x5ef   :  { %v2925_v54 = vpop.eup %2924 }
 0x5f0   :  { %2675 = vmatmul.mubr.msk.bf16.vlgmr.msra.gmra.mrb[20].mxu0 %vm915_vm5, %v1077_v29  ;;  %v1067_v50 = vmul.f32 %v2925_v54, %v3416_v39  ;;  %v1848_v59 = vpop.permute.xlu1 %1847 }
 0x5f1   :  { %2687 = vmatpush3.bf16.msra.mxu0 %v1525_v51  ;;  %2688 = vmatprep.mubr.msk.bf16.mxu0 %vm2989_vm1, %v2988_v32  ;;  %v1853_v61 = vsel %vm1089_vm2, %v1848_v59, 0  ;;  %v2873_v51 = vld [vmem:[%s3665_s6 + $0x38] sm:$0xff]  }
 0x5f2   :  { %2700 = vmatprep.subr.bf16.mxu0 %v2988_v32  ;;  %v1079_v10 = vpack.c.bf16 %v1067_v50, %v1067_v50  ;;  %v2877_v59 = vld [vmem:[%s3665_s6 + $0x58] sm:$0xff]  }
 0x5f3   :  { %v2927_v26 = vpop.eup %2926 }
 0x5f4   :  { %v1068_v57 = vmul.f32 %v2927_v26, %v3422_v41  ;;  %v2929_v38 = vpop.eup %2928  ;;  %v1960_v41 = vsel %vm1089_vm2, %v3189_v56, 0 }
 0x5f5   :  { %v1069_v25 = vmul.f32 %v2929_v38, %v3428_v47  ;;  %v2878_v38 = vld [vmem:[%s3665_s6 + $0x60] sm:$0xff]  }
 0x5f6   :  { %v1080_v39 = vpack.c.bf16 %v1068_v57, %v1068_v57 }
 0x5f7   :  { %v1081_v60 = vpack.c.bf16 %v1069_v25, %v1069_v25 }
 0x5f8   :  { %2689 = vmatmul.mubr.msk.bf16.vlgmr.msra.gmra.mrb[24].mxu0 %vm915_vm5, %v1078_v53 }
 0x5f9   :  { %2701 = vmatpush3.bf16.msra.mxu0 %v1635_v58  ;;  %2702 = vmatprep.mubr.msk.bf16.mxu0 %vm2989_vm1, %v2988_v32 }
 0x5fa   :  { %2714 = vmatprep.subr.bf16.mxu0 %v2988_v32 }
 0x600   :  { %2703 = vmatmul.mubr.msk.bf16.vlgmr.msra.gmra.mrb[28].mxu0 %vm915_vm5, %v1079_v10 }
 0x601   :  { %2715 = vmatpush3.bf16.msra.mxu0 %v1744_v36  ;;  %2716 = vmatprep.mubr.msk.bf16.mxu0 %vm2989_vm1, %v2988_v32 }
 0x602   :  { %2728 = vmatprep.subr.bf16.mxu0 %v2988_v32 }
 0x608   :  { %2717 = vmatmul.mubr.msk.bf16.vlgmr.msra.gmra.mrb[32].mxu0 %vm915_vm5, %v1080_v39 }
 0x609   :  { %2729 = vmatpush3.bf16.msra.mxu0 %v1853_v61  ;;  %2730 = vmatprep.mubr.msk.bf16.mxu0 %vm2989_vm1, %v2988_v32 }
 0x60a   :  { %2742 = vmatprep.subr.bf16.mxu0 %v2988_v32 }
 0x610   :  { %2731 = vmatmul.mubr.msk.bf16.vlgmr.msra.gmra.mrb[36].mxu0 %vm915_vm5, %v1081_v60 }
 0x611   :  { %2743 = vmatpush3.bf16.msra.mxu0 %v1960_v41  ;;  %2744 = vmatprep.mubr.msk.bf16.mxu0 %vm2989_vm1, %v2988_v32 }
 0x612   :  { %2756 = vmatprep.subr.bf16.mxu0 %v2988_v32 }
 0x61c   :  { %v1034_v47 = vpop.xlane.xlu0 %1033 }
 0x61d   :  { %v1048_v2 = vmax.f32 %v1034_v47, 1e-30 }
 0x61f   :  { %v1028_v62 = vpop.xlane.xlu1 %1027 }
 0x620   :  { %v1046_v1 = vmax.f32 %v1028_v62, 1e-30  ;;  %v2065_v4 = vpop.permute.xlu0 %2064  ;;  %v2879_v62 = vld [vmem:[%s3665_s6 + $0x68] sm:$0xff]  }
 0x621   :  { %v2070_v8 = vsel %vm1089_vm2, %v2065_v4, 0 }
 0x622   :  { %2930 = vrcp.f32 %v1046_v1 }
 0x623   :  { %v1031_v42 = vpop.xlane.xlu1 %1030 }
 0x624   :  { %v1047_v11 = vmax.f32 %v1031_v42, 1e-30  ;;  %v2283_v17 = vpop.permute.xlu0 %2282  ;;  %v2880_v42 = vld [vmem:[%s3665_s6 + $0x70] sm:$0xff]  }
 0x625   :  { %v2288_v12 = vsel %vm1089_vm2, %v2283_v17, 0  ;;  %v2885_v17 = vld [vmem:[%s3665_s6 + $0x98] sm:$0xff]  }
 0x626   :  { %2932 = vrcp.f32 %v1047_v11 }
 0x627   :  { %2934 = vrcp.f32 %v1048_v2  ;;  %v1037_v56 = vpop.xlane.xlu1 %1036 }
 0x628   :  { %v1049_v24 = vmax.f32 %v1037_v56, 1e-30  ;;  %v2882_v56 = vld [vmem:[%s3665_s6 + $0x80] sm:$0xff]  }
 0x62a   :  { %2936 = vrcp.f32 %v1049_v24 }
 0x62c   :  { %v2931_v55 = vpop.eup %2930 }
 0x62d   :  { %v1070_v48 = vmul.f32 %v2931_v55, %v3456_v7  ;;  %v2174_v7 = vpop.permute.xlu1 %2173 }
 0x62e   :  { %v2179_v15 = vsel %vm1089_vm2, %v2174_v7, 0 }
 0x62f   :  { %v1082_v5 = vpack.c.bf16 %v1070_v48, %v1070_v48  ;;  %v2881_v48 = vld [vmem:[%s3665_s6 + $0x78] sm:$0xff]  }
 0x630   :  { %v2933_v0 = vpop.eup %2932 }
 0x631   :  { %2745 = vmatmul.mubr.msk.bf16.vlgmr.msra.gmra.mrb[40].mxu0 %vm915_vm5, %v1082_v5  ;;  %v1071_v33 = vmul.f32 %v2933_v0, %v3464_v37  ;;  %v2935_v13 = vpop.eup %2934  ;;  %v2871_v37 = vld [vmem:[%s3665_s6 + $0x28] sm:$0xff]  }
 0x632   :  { %2757 = vmatpush3.bf16.msra.mxu0 %v2070_v8  ;;  %2758 = vmatprep.mubr.msk.bf16.mxu0 %vm2989_vm1, %v2988_v32  ;;  %v1072_v16 = vmul.f32 %v2935_v13, %v3452_v6 }
 0x633   :  { %2770 = vmatprep.subr.bf16.mxu0 %v2988_v32  ;;  %v1083_v9 = vpack.c.bf16 %v1071_v33, %v1071_v33  ;;  %2667 = vmatpush3.bf16.msra.mxu1 %v2871_v37  ;;  %v2883_v33 = vld [vmem:[%s3665_s6 + $0x88] sm:$0xff]  }
 0x634   :  { %2678 = vmatprep.subr.bf16.mxu1 %v2988_v32  ;;  %v1084_v18 = vpack.c.bf16 %v1072_v16, %v1072_v16  ;;  %v2937_v3 = vpop.eup %2936 }
 0x635   :  { %v1073_v6 = vmul.f32 %v2937_v3, %v3470_v14  ;;  %v2886_v3 = vld [vmem:[%s3665_s6 + $0xa0] sm:$0xff]  }
 0x637   :  { %v1085_v20 = vpack.c.bf16 %v1073_v6, %v1073_v6 }
 0x639   :  { %2759 = vmatmul.mubr.msk.bf16.vlgmr.msra.gmra.mrb[44].mxu0 %vm915_vm5, %v1083_v9  ;;  %v2884_v9 = vld [vmem:[%s3665_s6 + $0x90] sm:$0xff]  }
 0x63a   :  { %2771 = vmatpush3.bf16.msra.mxu0 %v2179_v15  ;;  %2772 = vmatprep.mubr.msk.bf16.mxu0 %vm2989_vm1, %v2988_v32 }
 0x63b   :  { %2784 = vmatprep.subr.bf16.mxu0 %v2988_v32 }
 0x641   :  { %2773 = vmatmul.mubr.msk.bf16.vlgmr.msra.gmra.mrb[48].mxu0 %vm915_vm5, %v1084_v18 }
 0x642   :  { %2785 = vmatpush3.bf16.msra.mxu0 %v2288_v12  ;;  %2786 = vmatprep.mubr.msk.bf16.mxu0 %vm2989_vm1, %v2988_v32 }
 0x649   :  { %2787 = vmatmul.mubr.msk.bf16.vlgmr.msra.gmra.mrb[52].mxu0 %vm915_vm5, %v1085_v20 }
 0x650   :  { %v1297_v23 = vpop.f32.mrb[16].mxu1 }
 0x651   :  { %v2656_v31 = vpop.f32.mrb[17].mxu1 }
 0x652   :  { %v1300_v21 = vpop.f32.mrb[18].mxu1  ;;  %v2887_v31 = vld [vmem:[%s3665_s6 + $0xa8] sm:$0xff]  }
 0x653   :  { %v2657_v22 = vpop.f32.mrb[19].mxu1 }
 0x654   :  { %v2888_v22 = vld [vmem:[%s3665_s6 + $0xb0] sm:$0xff]  }
 0x658   :  { %v1242_v40 = vpop.f32.mrb[12].mxu0 }
 0x659   :  { %v3545_v30 = vadd.f32 %v1297_v23, %v1242_v40  ;;  %v2648_v28 = vpop.f32.mrb[13].mxu0 }
 0x65a   :  { %v1245_v35 = vpop.f32.mrb[14].mxu0 }
 0x65b   :  { %v2649_v43 = vpop.f32.mrb[15].mxu0 }
 0x6bb   :  { %v1345_v44 = vpop.f32.mrb[16].mxu0 }
 0x6bc   :  { %v1351_v29 = vpack.c.bf16 %v1345_v44, %v1345_v44  ;;  %v2662_v14 = vpop.f32.mrb[17].mxu0  ;;  %v2889_v44 = vld [vmem:[%s3665_s6 + $0xb8] sm:$0xff]   ;;  %s2995_s6 = smov [#allocation5]  }
 0x6bd   :  { %v1348_v46 = vpop.f32.mrb[18].mxu0  ;;  %s2407_s22 = sshll.u32 %s2995_s6, 4  ;;  %s2408_s22 = int_to_ptr.vmem [resolvable:$true] %s2407_s22 }
 0x6be   :  { %v2663_v49 = vpop.f32.mrb[19].mxu0  ;;  %2669 = vmatmul.mubr.msk.bf16.vlgmr.msra.gmra.mrb[20].mxu1 %vm1204_vm4, %v1351_v29  ;;  %s2960_s1 = scalar_lea.vmem %s2408_s22, 128  ;;  %p2965_p9 = scmp.lt.s32.totalorder %s2408_s22, %s2408_s22 }
 0x6bf   :  { %2679 = vmatpush3.bf16.msra.mxu1 %v2872_v45  ;;  %2682 = vmatprep.mubr.msk.bf16.mxu1 %vm2989_vm1, %v2988_v32  ;;  %p2961_p8 = scmp.ne.s32.totalorder %s2408_s22, %s2960_s1  ;;  %p2966_p10 = scmp.lt.s32.totalorder %s2960_s1, %s2960_s1 }
 0x6c0   :  { %2680 = vmatprep.subr.bf16.mxu1 %v2988_v32 }
 0x6c1   :  { %p2967_p11 = por %p2966_p10, %p2965_p9 }
 0x6c3   :  { %v1454_v19 = vpop.f32.mrb[20].mxu0  ;;  %2681 = vmatpush3.bf16.msra.mxu1 %v2873_v51  ;;  %p2968_p12 = pnand %p2967_p11, %p2961_p8 }
 0x6c4   :  { %v1460_v27 = vpack.c.bf16 %v1454_v19, %v1454_v19  ;;  %v2676_v53 = vpop.f32.mrb[21].mxu0  ;;  %2692 = vmatprep.subr.bf16.mxu1 %v2988_v32 }
 0x6c5   :  { %v1457_v54 = vpop.f32.mrb[22].mxu0 }
 0x6c6   :  { %v2677_v58 = vpop.f32.mrb[23].mxu0  ;;  %2683 = vmatmul.mubr.msk.bf16.vlgmr.msra.gmra.mrb[24].mxu1 %vm1204_vm4, %v1460_v27 }
 0x6c7   :  { %2693 = vmatpush3.bf16.msra.mxu1 %v2874_v52  ;;  %2696 = vmatprep.mubr.msk.bf16.mxu1 %vm2989_vm1, %v2988_v32 }
 0x6c8   :  { %2694 = vmatprep.subr.bf16.mxu1 %v2988_v32 }
 0x6cb   :  { %v1561_v50 = vpop.f32.mrb[24].mxu0  ;;  %2695 = vmatpush3.bf16.msra.mxu1 %v2875_v63 }
 0x6cc   :  { %v1567_v10 = vpack.c.bf16 %v1561_v50, %v1561_v50  ;;  %v2690_v26 = vpop.f32.mrb[25].mxu0  ;;  %2706 = vmatprep.subr.bf16.mxu1 %v2988_v32 }
 0x6cd   :  { %v1564_v36 = vpop.f32.mrb[26].mxu0 }
 0x6ce   :  { %v2691_v57 = vpop.f32.mrb[27].mxu0  ;;  %2697 = vmatmul.mubr.msk.bf16.vlgmr.msra.gmra.mrb[28].mxu1 %vm1204_vm4, %v1567_v10 }
 0x6cf   :  { %2707 = vmatpush3.bf16.msra.mxu1 %v2876_v34  ;;  %2710 = vmatprep.mubr.msk.bf16.mxu1 %vm2989_vm1, %v2988_v32 }
 0x6d0   :  { %2708 = vmatprep.subr.bf16.mxu1 %v2988_v32 }
 0x6d3   :  { %v1671_v39 = vpop.f32.mrb[28].mxu0  ;;  %2709 = vmatpush3.bf16.msra.mxu1 %v2877_v59 }
 0x6d4   :  { %v1677_v61 = vpack.c.bf16 %v1671_v39, %v1671_v39  ;;  %v2704_v25 = vpop.f32.mrb[29].mxu0  ;;  %2720 = vmatprep.subr.bf16.mxu1 %v2988_v32 }
 0x6d5   :  { %v1674_v60 = vpop.f32.mrb[30].mxu0 }
 0x6d6   :  { %v2705_v41 = vpop.f32.mrb[31].mxu0  ;;  %2711 = vmatmul.mubr.msk.bf16.vlgmr.msra.gmra.mrb[32].mxu1 %vm1204_vm4, %v1677_v61 }
 0x6d7   :  { %2721 = vmatpush3.bf16.msra.mxu1 %v2878_v38  ;;  %2724 = vmatprep.mubr.msk.bf16.mxu1 %vm2989_vm1, %v2988_v32 }
 0x6d8   :  { %2722 = vmatprep.subr.bf16.mxu1 %v2988_v32 }
 0x6db   :  { %v1780_v1 = vpop.f32.mrb[32].mxu0  ;;  %2723 = vmatpush3.bf16.msra.mxu1 %v2879_v62 }
 0x6dc   :  { %v1786_v11 = vpack.c.bf16 %v1780_v1, %v1780_v1  ;;  %v2718_v47 = vpop.f32.mrb[33].mxu0  ;;  %2734 = vmatprep.subr.bf16.mxu1 %v2988_v32 }
 0x6dd   :  { %v1783_v2 = vpop.f32.mrb[34].mxu0 }
 0x6de   :  { %v2719_v55 = vpop.f32.mrb[35].mxu0  ;;  %2725 = vmatmul.mubr.msk.bf16.vlgmr.msra.gmra.mrb[36].mxu1 %vm1204_vm4, %v1786_v11 }
 0x6df   :  { %2735 = vmatpush3.bf16.msra.mxu1 %v2880_v42  ;;  %2738 = vmatprep.mubr.msk.bf16.mxu1 %vm2989_vm1, %v2988_v32 }
 0x6e0   :  { %2736 = vmatprep.subr.bf16.mxu1 %v2988_v32 }
 0x6e3   :  { %v1889_v4 = vpop.f32.mrb[36].mxu0  ;;  %2737 = vmatpush3.bf16.msra.mxu1 %v2881_v48 }
 0x6e4   :  { %v1895_v5 = vpack.c.bf16 %v1889_v4, %v1889_v4  ;;  %v2732_v0 = vpop.f32.mrb[37].mxu0  ;;  %2748 = vmatprep.subr.bf16.mxu1 %v2988_v32 }
 0x6e5   :  { %v1892_v8 = vpop.f32.mrb[38].mxu0 }
 0x6e6   :  { %v2733_v24 = vpop.f32.mrb[39].mxu0  ;;  %2739 = vmatmul.mubr.msk.bf16.vlgmr.msra.gmra.mrb[40].mxu1 %vm1204_vm4, %v1895_v5 }
 0x6e7   :  { %2749 = vmatpush3.bf16.msra.mxu1 %v2882_v56  ;;  %2752 = vmatprep.mubr.msk.bf16.mxu1 %vm2989_vm1, %v2988_v32 }
 0x6e8   :  { %2750 = vmatprep.subr.bf16.mxu1 %v2988_v32 }
 0x6eb   :  { %2751 = vmatpush3.bf16.msra.mxu1 %v2883_v33 }
 0x6ec   :  { %2762 = vmatprep.subr.bf16.mxu1 %v2988_v32 }
 0x704   :  { %v1996_v7 = vpop.f32.mrb[40].mxu0 }
 0x705   :  { %v2002_v13 = vpack.c.bf16 %v1996_v7, %v1996_v7  ;;  %v2746_v15 = vpop.f32.mrb[41].mxu0 }
 0x706   :  { %v1999_v16 = vpop.f32.mrb[42].mxu0 }
 0x707   :  { %v2747_v37 = vpop.f32.mrb[43].mxu0  ;;  %2753 = vmatmul.mubr.msk.bf16.vlgmr.msra.gmra.mrb[44].mxu1 %vm1204_vm4, %v2002_v13 }
 0x708   :  { %2763 = vmatpush3.bf16.msra.mxu1 %v2884_v9  ;;  %2766 = vmatprep.mubr.msk.bf16.mxu1 %vm2989_vm1, %v2988_v32 }
 0x709   :  { %2764 = vmatprep.subr.bf16.mxu1 %v2988_v32 }
 0x70c   :  { %v2106_v18 = vpop.f32.mrb[44].mxu0  ;;  %2765 = vmatpush3.bf16.msra.mxu1 %v2885_v17 }
 0x70d   :  { %v2112_v12 = vpack.c.bf16 %v2106_v18, %v2106_v18  ;;  %v2760_v6 = vpop.f32.mrb[45].mxu0  ;;  %2776 = vmatprep.subr.bf16.mxu1 %v2988_v32 }
 0x70e   :  { %v2109_v20 = vpop.f32.mrb[46].mxu0 }
 0x70f   :  { %v2761_v23 = vpop.f32.mrb[47].mxu0  ;;  %2767 = vmatmul.mubr.msk.bf16.vlgmr.msra.gmra.mrb[48].mxu1 %vm1204_vm4, %v2112_v12 }
 0x710   :  { %2777 = vmatpush3.bf16.msra.mxu1 %v2886_v3  ;;  %2780 = vmatprep.mubr.msk.bf16.mxu1 %vm2989_vm1, %v2988_v32  ;;  %v2508_v3 = vld [vmem:[#allocation2] ss:$0 sm:$0xff] }
 0x711   :  { %2778 = vmatprep.subr.bf16.mxu1 %v2988_v32 }
 0x714   :  { %v2215_v21 = vpop.f32.mrb[48].mxu0  ;;  %2779 = vmatpush3.bf16.msra.mxu1 %v2887_v31 }
 0x715   :  { %v2221_v40 = vpack.c.bf16 %v2215_v21, %v2215_v21  ;;  %v2774_v28 = vpop.f32.mrb[49].mxu0  ;;  %2790 = vmatprep.subr.bf16.mxu1 %v2988_v32 }
 0x716   :  { %v2218_v35 = vpop.f32.mrb[50].mxu0 }
 0x717   :  { %v2775_v43 = vpop.f32.mrb[51].mxu0  ;;  %2781 = vmatmul.mubr.msk.bf16.vlgmr.msra.gmra.mrb[52].mxu1 %vm1204_vm4, %v2221_v40 }
 0x718   :  { %2791 = vmatpush3.bf16.msra.mxu1 %v2888_v22  ;;  %2794 = vmatprep.mubr.msk.bf16.mxu1 %vm2989_vm1, %v2988_v32 }
 0x719   :  { %2792 = vmatprep.subr.bf16.mxu1 %v2988_v32 }
 0x71c   :  { %v2324_v45 = vpop.f32.mrb[52].mxu0  ;;  %2793 = vmatpush3.bf16.msra.mxu1 %v2889_v44 }
 0x71d   :  { %v2330_v29 = vpack.c.bf16 %v2324_v45, %v2324_v45  ;;  %v2788_v14 = vpop.f32.mrb[53].mxu0 }
 0x71e   :  { %v2327_v46 = vpop.f32.mrb[54].mxu0 }
 0x71f   :  { %v2789_v49 = vpop.f32.mrb[55].mxu0  ;;  %2795 = vmatmul.mubr.msk.bf16.vlgmr.msra.gmra.mrb[56].mxu1 %vm1204_vm4, %v2330_v29 }
 0x791   :  { %v1405_v51 = vpop.f32.mrb[20].mxu1 }
 0x792   :  { %v1411_v19 = vadd.f32 %v1405_v51, %v3545_v30  ;;  %v2670_v52 = vpop.f32.mrb[21].mxu1 }
 0x793   :  { %v1408_v27 = vpop.f32.mrb[22].mxu1 }
 0x794   :  { %v2671_v53 = vpop.f32.mrb[23].mxu1 }
 0x799   :  { %v1514_v54 = vpop.f32.mrb[24].mxu1 }
 0x79a   :  { %v1520_v58 = vadd.f32 %v1514_v54, %v1411_v19  ;;  %v2684_v63 = vpop.f32.mrb[25].mxu1 }
 0x79b   :  { %v1517_v50 = vpop.f32.mrb[26].mxu1 }
 0x79c   :  { %v2685_v34 = vpop.f32.mrb[27].mxu1 }
 0x7a1   :  { %v1621_v32 = vpop.f32.mrb[28].mxu1 }
 0x7a2   :  { %v1627_v10 = vadd.f32 %v1621_v32, %v1520_v58  ;;  %v2698_v26 = vpop.f32.mrb[29].mxu1 }
 0x7a3   :  { %v1624_v36 = vpop.f32.mrb[30].mxu1 }
 0x7a4   :  { %v2699_v57 = vpop.f32.mrb[31].mxu1 }
 0x7a9   :  { %v1731_v59 = vpop.f32.mrb[32].mxu1 }
 0x7aa   :  { %v1737_v39 = vadd.f32 %v1731_v59, %v1627_v10  ;;  %v2712_v38 = vpop.f32.mrb[33].mxu1 }
 0x7ab   :  { %v1734_v61 = vpop.f32.mrb[34].mxu1 }
 0x7ac   :  { %v2713_v25 = vpop.f32.mrb[35].mxu1 }
 0x7b1   :  { %v1840_v60 = vpop.f32.mrb[36].mxu1 }
 0x7b2   :  { %v1846_v30 = vadd.f32 %v1840_v60, %v1737_v39  ;;  %v2726_v41 = vpop.f32.mrb[37].mxu1 }
 0x7b3   :  { %v1843_v62 = vpop.f32.mrb[38].mxu1 }
 0x7b4   :  { %v2727_v1 = vpop.f32.mrb[39].mxu1 }
 0x7b9   :  { %v1949_v42 = vpop.f32.mrb[40].mxu1 }
 0x7ba   :  { %v1955_v11 = vadd.f32 %v1949_v42, %v1846_v30  ;;  %v2740_v47 = vpop.f32.mrb[41].mxu1 }
 0x7bb   :  { %v1952_v2 = vpop.f32.mrb[42].mxu1 }
 0x7bc   :  { %v2741_v55 = vpop.f32.mrb[43].mxu1 }
 0x7da   :  { %v2056_v48 = vpop.f32.mrb[44].mxu1 }
 0x7db   :  { %v2062_v4 = vadd.f32 %v2056_v48, %v1955_v11  ;;  %v2754_v56 = vpop.f32.mrb[45].mxu1 }
 0x7dc   :  { %v2059_v5 = vpop.f32.mrb[46].mxu1 }
 0x7dd   :  { %v2755_v0 = vpop.f32.mrb[47].mxu1 }
 0x7e2   :  { %v2166_v8 = vpop.f32.mrb[48].mxu1 }
 0x7e3   :  { %v2172_v24 = vadd.f32 %v2166_v8, %v2062_v4  ;;  %v2768_v33 = vpop.f32.mrb[49].mxu1 }
 0x7e4   :  { %v2169_v7 = vpop.f32.mrb[50].mxu1 }
 0x7e5   :  { %v2769_v9 = vpop.f32.mrb[51].mxu1 }
 0x7ea   :  { %v2275_v13 = vpop.f32.mrb[52].mxu1 }
 0x7eb   :  { %v2281_v15 = vadd.f32 %v2275_v13, %v2172_v24  ;;  %v2782_v16 = vpop.f32.mrb[53].mxu1 }
 0x7ec   :  { %v2278_v37 = vpop.f32.mrb[54].mxu1 }
 0x7ed   :  { %v2783_v17 = vpop.f32.mrb[55].mxu1 }
 0x7f2   :  { %v2384_v18 = vpop.f32.mrb[56].mxu1 }
 0x7f3   :  { %v2390_v12 = vadd.f32 %v2384_v18, %v2281_v15  ;;  %v2796_v6 = vpop.f32.mrb[57].mxu1 }
 0x7f4   :  { %v2387_v20 = vpop.f32.mrb[58].mxu1 }
 0x7f5   :  { %v2398_v23 = vadd.f32 %v2508_v3, %v2390_v12  ;;  %v2797_v31 = vpop.f32.mrb[59].mxu1 }
 0x7f7   :  { %v2399_v21 = vmax.f32 %v2398_v23, 0.0 }
 0x7f9   :  { %2400 = vst [vmem:[#allocation5] sm:$0xff] %v2399_v21 }
 0x7fa   :  { %2971 = shalt.err (!%p2968_p12)
}
 0x7fb   :  { %s2972_s24 = scalar_lea.hbm %s3667_s8, 128 }
 0x7fc   :  { %p2973_p13 = scmp.ne.s32.totalorder %s3667_s8, %s2972_s24  ;;  %p2976_p0 = scmp.lt.u32.totalorder %s2972_s24, %s3667_s8 }
 0x7fe   :  { %p2978_p1 = pnand %p2976_p0, %p2973_p13 }
 0x800   :  { %2981 = shalt.err (!%p2978_p1)
}
 0x801   :  { %2410 = dma.vmem_to_hbm [thread:$0]  %s2408_s22, 128, %s3667_s8, [#allocation4]  }
 0x802   :  { %2984 = dma.done.wait [#allocation4], 128  }
 0x803   :  { %2985 = vsyncadd [#allocation4], 4294967168 }
 0x804   :  { %2414 = vsyncpa [#allocation3], 1 }
 0x805   :  { %2415 = vsyncpa [#allocation4], 1 }

</bundles_post_ra>
